<compile_context>
chip_gen: v7x
topology: tpu7x:2x2x1
jax: 0.10.0
libtpu: 0.0.40
codegen_flags: <defaults>
</compile_context>

<pallas_src>
import numpy as np
import jax
import jax.numpy as jnp
from jax.experimental import pallas as pl
from jax.experimental.pallas import tpu as pltpu

NEG_SLOPE = 0.01   # nn.LeakyReLU default
BN_EPS = 1e-5      # nn.BatchNorm1d default


def _leaky_relu(y):
    return jnp.where(y > 0, y, NEG_SLOPE * y)


def _conv_out_len(lin, k, stride):
    return (lin - k) // stride + 1


def _tap_weight_stack(w, cin, cout, k, groups, n):
    """Stacked per-tap maps: rows [kk*cin*n:(kk+1)*cin*n] hold W_kk with
    W_kk[ci*n + j, co*n + j] = w[co, ci_local, kk]  (group-aware, j = sample)."""
    w = np.asarray(w, np.float32)
    cin_g = cin // groups
    cout_g = cout // groups
    ws = np.zeros((k, cin * n, cout * n), np.float32)
    for co in range(cout):
        g = co // cout_g
        for cil in range(cin_g):
            ci = g * cin_g + cil
            for kk in range(k):
                for j in range(n):
                    ws[kk, ci * n + j, co * n + j] = w[co, cil, kk]
    return ws.reshape(k * cin * n, cout * n)


def _pool_mats(c, n):
    """(c*n, c) column->channel pooling matrix and its (c, c*n) transpose."""
    p = np.kron(np.eye(c, dtype=np.float32), np.ones((n, 1), np.float32))
    return p, np.ascontiguousarray(p.T)


def _make_kernel(n, cin, lin):
    k1, st1, c1 = 9, 4, 8
    k2, st2, c2 = 7, 3, 4
    k3, st3, c3 = 5, 2, 2
    l1 = _conv_out_len(lin, k1, st1)
    l2 = _conv_out_len(l1, k2, st2)
    l3 = _conv_out_len(l2, k3, st3)
    inv1, inv2, inv3 = 1.0 / (n * l1), 1.0 / (n * l2), 1.0 / (n * l3)

    def batchnorm(y, g_ref, be_ref, p_ref, pt_ref, inv_count):
        # One MXU pass for (sum, sum_sq) channel pooling.
        s = jnp.sum(y, axis=0, keepdims=True)                 # (1, C*N)
        ss = jnp.sum(y * y, axis=0, keepdims=True)            # (1, C*N)
        st = jnp.concatenate([s, ss], axis=0)                 # (2, C*N)
        ch = jnp.dot(st, p_ref[...], preferred_element_type=jnp.float32)  # (2, C)
        mean = ch[0:1, :] * inv_count
        var = jnp.maximum(ch[1:2, :] * inv_count - mean * mean, 0.0)  # clamp >= 0
        a = g_ref[...] * jax.lax.rsqrt(var + BN_EPS)           # (1, C)
        b = be_ref[...] - mean * a                             # (1, C)
        # Single stacked broadcast back to column space.
        ab = jnp.dot(jnp.concatenate([a, b], axis=0), pt_ref[...],
                     preferred_element_type=jnp.float32)       # (2, C*N)
        return y * ab[0:1, :] + ab[1:2, :]

    def conv_taps(src_ref, w_ref, b_ref, k, stride, cin_n, lout):
        # K strided-tap loads + tiny (L_out, Cin*N) @ (Cin*N, Cout*N) matmuls.
        acc = None
        for kk in range(k):
            tap = src_ref[pl.ds(kk, lout, stride=stride), :]       # (L_out, Cin*N)
            wk = w_ref[pl.ds(kk * cin_n, cin_n), :]                # (Cin*N, Cout*N)
            d = jnp.dot(tap, wk, preferred_element_type=jnp.float32)
            acc = d if acc is None else acc + d
        return acc + b_ref[...]

    def kernel(x_ref,
               w1_ref, b1_ref, g1_ref, be1_ref, p1_ref, p1t_ref,
               w2_ref, b2_ref, g2_ref, be2_ref, p2_ref, p2t_ref,
               w3_ref, b3_ref, g3_ref, be3_ref, p3_ref, p3t_ref,
               wl1_ref, bl1_ref, wl2_ref, bl2_ref, wl3_ref, bl3_ref,
               o_ref, buf1, buf2):
        # --- encoder block 1: grouped conv1 -> LeakyReLU -> BatchNorm ---
        y = conv_taps(x_ref, w1_ref, b1_ref, k1, st1, cin * n, l1)
        y = batchnorm(_leaky_relu(y), g1_ref, be1_ref, p1_ref, p1t_ref, inv1)
        buf1[...] = y                                           # (l1, 8*N)
        # --- encoder block 2 ---
        y = conv_taps(buf1, w2_ref, b2_ref, k2, st2, c1 * n, l2)
        y = batchnorm(_leaky_relu(y), g2_ref, be2_ref, p2_ref, p2t_ref, inv2)
        buf2[...] = y                                           # (l2, 4*N)
        # --- encoder block 3 ---
        y = conv_taps(buf2, w3_ref, b3_ref, k3, st3, c2 * n, l3)
        y = batchnorm(_leaky_relu(y), g3_ref, be3_ref, p3_ref, p3t_ref, inv3)
        # y is (l3, 2*N), column = c*N + j.  x.view(-1, 36) transposed is
        # hT[c*l3 + l, j] = y[l, c*N + j]; fold that split into Linear #1.
        z = bl1_ref[...]                                        # (18, 1)
        for c in range(c3):
            z = z + jnp.dot(wl1_ref[:, c * l3:(c + 1) * l3],
                            y[:, c * n:(c + 1) * n],
                            preferred_element_type=jnp.float32)
        z = _leaky_relu(z)                                      # (18, N)
        z = _leaky_relu(jnp.dot(wl2_ref[...], z,
                                preferred_element_type=jnp.float32) + bl2_ref[...])
        z = jnp.dot(wl3_ref[...], z,
                    preferred_element_type=jnp.float32) + bl3_ref[...]   # (2, N)
        # Sigmoid via EUP reciprocal.
        o_ref[...] = pl.reciprocal(1.0 + jnp.exp(-z), approx=True)

    return kernel, (l1, l2, l3)


def make_discriminator_forward(params, in_channels, batch, lin):
    """Build all parameter glue ONCE; return a jitted forward fn of x."""
    n, f32 = batch, np.float32
    kernel, (l1, l2, l3) = _make_kernel(n, in_channels, lin)
    assert 2 * l3 == 36, "input length must produce 36 flattened features"

    w1 = _tap_weight_stack(params['conv1_w'], in_channels, 8, 9, in_channels, n)
    w2 = _tap_weight_stack(params['conv2_w'], 8, 4, 7, 1, n)
    w3 = _tap_weight_stack(params['conv3_w'], 4, 2, 5, 1, n)
    b1 = np.repeat(np.asarray(params['conv1_b'], f32), n)[None, :]
    b2 = np.repeat(np.asarray(params['conv2_b'], f32), n)[None, :]
    b3 = np.repeat(np.asarray(params['conv3_b'], f32), n)[None, :]
    g1, be1 = np.asarray(params['bn1_g'], f32)[None, :], np.asarray(params['bn1_b'], f32)[None, :]
    g2, be2 = np.asarray(params['bn2_g'], f32)[None, :], np.asarray(params['bn2_b'], f32)[None, :]
    g3, be3 = np.asarray(params['bn3_g'], f32)[None, :], np.asarray(params['bn3_b'], f32)[None, :]
    p1, p1t = _pool_mats(8, n)
    p2, p2t = _pool_mats(4, n)
    p3, p3t = _pool_mats(2, n)
    wl1 = np.asarray(params['lin1_w'], f32)            # (18, 36)
    wl2 = np.asarray(params['lin2_w'], f32)            # (9, 18)
    wl3 = np.asarray(params['lin3_w'], f32)            # (2, 9)
    bl1 = np.asarray(params['lin1_b'], f32)[:, None]   # (18, 1)
    bl2 = np.asarray(params['lin2_b'], f32)[:, None]
    bl3 = np.asarray(params['lin3_b'], f32)[:, None]

    consts = tuple(jnp.asarray(a) for a in
                   (w1, b1, g1, be1, p1, p1t,
                    w2, b2, g2, be2, p2, p2t,
                    w3, b3, g3, be3, p3, p3t,
                    wl1, bl1, wl2, bl2, wl3, bl3))

    vmem = pl.BlockSpec(memory_space=pltpu.MemorySpace.VMEM)
    # Total VMEM footprint is well under the v5e 16 MiB default scoped limit;
    # set pltpu.CompilerParams(vmem_limit_bytes=...) only if batch/L_IN grows.
    pcall = pl.pallas_call(
        kernel,
        out_shape=jax.ShapeDtypeStruct((2, n), jnp.float32),
        in_specs=[vmem] * (1 + len(consts)),
        out_specs=vmem,
        scratch_shapes=[pltpu.VMEM((l1, 8 * n), jnp.float32),
                        pltpu.VMEM((l2, 4 * n), jnp.float32)],
    )

    @jax.jit
    def forward(x):
        # NCL -> (L, Cin*N) column layout (column = ci*N + n), pure layout glue.
        x_t = jnp.transpose(x, (2, 1, 0)).reshape(lin, in_channels * n)
        return pcall(x_t, *consts).T          # kernel emits (2, N) -> (N, 2)

    return forward


def reference_forward(x, params):
    """Pure-JAX reference mirroring the PyTorch forward (training-mode BN)."""
    def conv_bn(h, w, b, gamma, beta, stride, groups):
        y = jax.lax.conv_general_dilated(
            h, w, (stride,), 'VALID',
            dimension_numbers=('NCH', 'OIH', 'NCH'),
            feature_group_count=groups)
        y = y + b[None, :, None]
        y = _leaky_relu(y)
        mean = jnp.mean(y, axis=(0, 2), keepdims=True)
        var = jnp.mean(y * y, axis=(0, 2), keepdims=True) - mean * mean
        y = (y - mean) * jax.lax.rsqrt(var + BN_EPS)
        return y * gamma[None, :, None] + beta[None, :, None]

    h = conv_bn(x, params['conv1_w'], params['conv1_b'],
                params['bn1_g'], params['bn1_b'], 4, x.shape[1])
    h = conv_bn(h, params['conv2_w'], params['conv2_b'],
                params['bn2_g'], params['bn2_b'], 3, 1)
    h = conv_bn(h, params['conv3_w'], params['conv3_b'],
                params['bn3_g'], params['bn3_b'], 2, 1)
    h = h.reshape(-1, 36)
    h = _leaky_relu(h @ params['lin1_w'].T + params['lin1_b'])
    h = _leaky_relu(h @ params['lin2_w'].T + params['lin2_b'])
    h = h @ params['lin3_w'].T + params['lin3_b']
    return jax.nn.sigmoid(h)


if __name__ == "__main__":
    IN_CHANNELS = 2     # must divide 8 (groups=in_channels in conv1)
    BATCH = 2
    L_IN = 505          # conv1 -> 125, conv2 -> 40, conv3 -> 18; 2*18 = 36 features

    key = jax.random.PRNGKey(0)
    ks = jax.random.split(key, 19)
    u = lambda k, shape, s=0.3: jax.random.uniform(k, shape, jnp.float32, -s, s)

    params = {
        'conv1_w': u(ks[0], (8, 1, 9)),  'conv1_b': u(ks[1], (8,)),
        'bn1_g': 1.0 + u(ks[2], (8,), 0.1), 'bn1_b': u(ks[3], (8,), 0.1),
        'conv2_w': u(ks[4], (4, 8, 7)),  'conv2_b': u(ks[5], (4,)),
        'bn2_g': 1.0 + u(ks[6], (4,), 0.1), 'bn2_b': u(ks[7], (4,), 0.1),
        'conv3_w': u(ks[8], (2, 4, 5)),  'conv3_b': u(ks[9], (2,)),
        'bn3_g': 1.0 + u(ks[10], (2,), 0.1), 'bn3_b': u(ks[11], (2,), 0.1),
        'lin1_w': u(ks[12], (18, 36)), 'lin1_b': u(ks[13], (18,)),
        'lin2_w': u(ks[14], (9, 18)),  'lin2_b': u(ks[15], (9,)),
        'lin3_w': u(ks[16], (2, 9)),   'lin3_b': u(ks[17], (2,)),
    }
    x = jax.random.normal(ks[18], (BATCH, IN_CHANNELS, L_IN), jnp.float32)

    discriminator_forward = make_discriminator_forward(params, IN_CHANNELS, BATCH, L_IN)
    out = jax.block_until_ready(discriminator_forward(x))
    ref = jax.block_until_ready(reference_forward(x, params))
    np.testing.assert_allclose(np.asarray(out), np.asarray(ref), rtol=5e-3, atol=5e-3)
    print("KERNEL_OK")
</pallas_src>

<mosaic_0001>
module attributes {stable_mosaic.version = 11 : i64} {
  func.func @kernel(%arg0: memref<505x4xf32, #tpu.memory_space<vmem>>, %arg1: memref<36x16xf32, #tpu.memory_space<vmem>>, %arg2: memref<1x16xf32, #tpu.memory_space<vmem>>, %arg3: memref<1x8xf32, #tpu.memory_space<vmem>>, %arg4: memref<1x8xf32, #tpu.memory_space<vmem>>, %arg5: memref<16x8xf32, #tpu.memory_space<vmem>>, %arg6: memref<8x16xf32, #tpu.memory_space<vmem>>, %arg7: memref<112x8xf32, #tpu.memory_space<vmem>>, %arg8: memref<1x8xf32, #tpu.memory_space<vmem>>, %arg9: memref<1x4xf32, #tpu.memory_space<vmem>>, %arg10: memref<1x4xf32, #tpu.memory_space<vmem>>, %arg11: memref<8x4xf32, #tpu.memory_space<vmem>>, %arg12: memref<4x8xf32, #tpu.memory_space<vmem>>, %arg13: memref<40x4xf32, #tpu.memory_space<vmem>>, %arg14: memref<1x4xf32, #tpu.memory_space<vmem>>, %arg15: memref<1x2xf32, #tpu.memory_space<vmem>>, %arg16: memref<1x2xf32, #tpu.memory_space<vmem>>, %arg17: memref<4x2xf32, #tpu.memory_space<vmem>>, %arg18: memref<2x4xf32, #tpu.memory_space<vmem>>, %arg19: memref<18x36xf32, #tpu.memory_space<vmem>>, %arg20: memref<18x1xf32, #tpu.memory_space<vmem>>, %arg21: memref<9x18xf32, #tpu.memory_space<vmem>>, %arg22: memref<9x1xf32, #tpu.memory_space<vmem>>, %arg23: memref<2x9xf32, #tpu.memory_space<vmem>>, %arg24: memref<2x1xf32, #tpu.memory_space<vmem>>, %arg25: memref<2x2xf32, #tpu.memory_space<vmem>>, %arg26: memref<125x16xf32, #tpu.memory_space<vmem>>, %arg27: memref<40x8xf32, #tpu.memory_space<vmem>>) attributes {dimension_semantics = [], scalar_prefetch = 0 : i64, scratch_operands = 2 : i64, tpu.core_type = #tpu.core_type<tc>} {
    %c0 = arith.constant 0 : index
    %c0_0 = arith.constant 0 : index
    %0 = tpu.strided_load %arg0[%c0, %c0_0] {strides = array<i32: 4, 1>} : memref<505x4xf32, #tpu.memory_space<vmem>>, vector<125x4xf32>
    %c0_1 = arith.constant 0 : index
    %c0_2 = arith.constant 0 : index
    %1 = vector.load %arg1[%c0_1, %c0_2] : memref<36x16xf32, #tpu.memory_space<vmem>>, vector<4x16xf32>
    %cst = arith.constant dense<0.000000e+00> : vector<125x16xf32>
    %2 = tpu.matmul %0, %1, %cst {dimension_numbers = #tpu.dot_dimension_numbers<[1], [0], [0], [1], [0, 0, 1, 1], [], []>} : vector<125x4xf32>, vector<4x16xf32>, vector<125x16xf32> -> vector<125x16xf32>
    %c1 = arith.constant 1 : index
    %c0_3 = arith.constant 0 : index
    %3 = tpu.strided_load %arg0[%c1, %c0_3] {strides = array<i32: 4, 1>} : memref<505x4xf32, #tpu.memory_space<vmem>>, vector<125x4xf32>
    %c4 = arith.constant 4 : index
    %c0_4 = arith.constant 0 : index
    %4 = vector.load %arg1[%c4, %c0_4] : memref<36x16xf32, #tpu.memory_space<vmem>>, vector<4x16xf32>
    %cst_5 = arith.constant dense<0.000000e+00> : vector<125x16xf32>
    %5 = tpu.matmul %3, %4, %cst_5 {dimension_numbers = #tpu.dot_dimension_numbers<[1], [0], [0], [1], [0, 0, 1, 1], [], []>} : vector<125x4xf32>, vector<4x16xf32>, vector<125x16xf32> -> vector<125x16xf32>
    %6 = arith.addf %2, %5 : vector<125x16xf32>
    %c2 = arith.constant 2 : index
    %c0_6 = arith.constant 0 : index
    %7 = tpu.strided_load %arg0[%c2, %c0_6] {strides = array<i32: 4, 1>} : memref<505x4xf32, #tpu.memory_space<vmem>>, vector<125x4xf32>
    %c8 = arith.constant 8 : index
    %c0_7 = arith.constant 0 : index
    %8 = vector.load %arg1[%c8, %c0_7] : memref<36x16xf32, #tpu.memory_space<vmem>>, vector<4x16xf32>
    %cst_8 = arith.constant dense<0.000000e+00> : vector<125x16xf32>
    %9 = tpu.matmul %7, %8, %cst_8 {dimension_numbers = #tpu.dot_dimension_numbers<[1], [0], [0], [1], [0, 0, 1, 1], [], []>} : vector<125x4xf32>, vector<4x16xf32>, vector<125x16xf32> -> vector<125x16xf32>
    %10 = arith.addf %6, %9 : vector<125x16xf32>
    %c3 = arith.constant 3 : index
    %c0_9 = arith.constant 0 : index
    %11 = tpu.strided_load %arg0[%c3, %c0_9] {strides = array<i32: 4, 1>} : memref<505x4xf32, #tpu.memory_space<vmem>>, vector<125x4xf32>
    %c12 = arith.constant 12 : index
    %c0_10 = arith.constant 0 : index
    %12 = vector.load %arg1[%c12, %c0_10] : memref<36x16xf32, #tpu.memory_space<vmem>>, vector<4x16xf32>
    %cst_11 = arith.constant dense<0.000000e+00> : vector<125x16xf32>
    %13 = tpu.matmul %11, %12, %cst_11 {dimension_numbers = #tpu.dot_dimension_numbers<[1], [0], [0], [1], [0, 0, 1, 1], [], []>} : vector<125x4xf32>, vector<4x16xf32>, vector<125x16xf32> -> vector<125x16xf32>
    %14 = arith.addf %10, %13 : vector<125x16xf32>
    %c4_12 = arith.constant 4 : index
    %c0_13 = arith.constant 0 : index
    %15 = tpu.strided_load %arg0[%c4_12, %c0_13] {strides = array<i32: 4, 1>} : memref<505x4xf32, #tpu.memory_space<vmem>>, vector<125x4xf32>
    %c16 = arith.constant 16 : index
    %c0_14 = arith.constant 0 : index
    %16 = vector.load %arg1[%c16, %c0_14] : memref<36x16xf32, #tpu.memory_space<vmem>>, vector<4x16xf32>
    %cst_15 = arith.constant dense<0.000000e+00> : vector<125x16xf32>
    %17 = tpu.matmul %15, %16, %cst_15 {dimension_numbers = #tpu.dot_dimension_numbers<[1], [0], [0], [1], [0, 0, 1, 1], [], []>} : vector<125x4xf32>, vector<4x16xf32>, vector<125x16xf32> -> vector<125x16xf32>
    %18 = arith.addf %14, %17 : vector<125x16xf32>
    %c5 = arith.constant 5 : index
    %c0_16 = arith.constant 0 : index
    %19 = tpu.strided_load %arg0[%c5, %c0_16] {strides = array<i32: 4, 1>} : memref<505x4xf32, #tpu.memory_space<vmem>>, vector<125x4xf32>
    %c20 = arith.constant 20 : index
    %c0_17 = arith.constant 0 : index
    %20 = vector.load %arg1[%c20, %c0_17] : memref<36x16xf32, #tpu.memory_space<vmem>>, vector<4x16xf32>
    %cst_18 = arith.constant dense<0.000000e+00> : vector<125x16xf32>
    %21 = tpu.matmul %19, %20, %cst_18 {dimension_numbers = #tpu.dot_dimension_numbers<[1], [0], [0], [1], [0, 0, 1, 1], [], []>} : vector<125x4xf32>, vector<4x16xf32>, vector<125x16xf32> -> vector<125x16xf32>
    %22 = arith.addf %18, %21 : vector<125x16xf32>
    %c6 = arith.constant 6 : index
    %c0_19 = arith.constant 0 : index
    %23 = tpu.strided_load %arg0[%c6, %c0_19] {strides = array<i32: 4, 1>} : memref<505x4xf32, #tpu.memory_space<vmem>>, vector<125x4xf32>
    %c24 = arith.constant 24 : index
    %c0_20 = arith.constant 0 : index
    %24 = vector.load %arg1[%c24, %c0_20] : memref<36x16xf32, #tpu.memory_space<vmem>>, vector<4x16xf32>
    %cst_21 = arith.constant dense<0.000000e+00> : vector<125x16xf32>
    %25 = tpu.matmul %23, %24, %cst_21 {dimension_numbers = #tpu.dot_dimension_numbers<[1], [0], [0], [1], [0, 0, 1, 1], [], []>} : vector<125x4xf32>, vector<4x16xf32>, vector<125x16xf32> -> vector<125x16xf32>
    %26 = arith.addf %22, %25 : vector<125x16xf32>
    %c7 = arith.constant 7 : index
    %c0_22 = arith.constant 0 : index
    %27 = tpu.strided_load %arg0[%c7, %c0_22] {strides = array<i32: 4, 1>} : memref<505x4xf32, #tpu.memory_space<vmem>>, vector<125x4xf32>
    %c28 = arith.constant 28 : index
    %c0_23 = arith.constant 0 : index
    %28 = vector.load %arg1[%c28, %c0_23] : memref<36x16xf32, #tpu.memory_space<vmem>>, vector<4x16xf32>
    %cst_24 = arith.constant dense<0.000000e+00> : vector<125x16xf32>
    %29 = tpu.matmul %27, %28, %cst_24 {dimension_numbers = #tpu.dot_dimension_numbers<[1], [0], [0], [1], [0, 0, 1, 1], [], []>} : vector<125x4xf32>, vector<4x16xf32>, vector<125x16xf32> -> vector<125x16xf32>
    %30 = arith.addf %26, %29 : vector<125x16xf32>
    %c8_25 = arith.constant 8 : index
    %c0_26 = arith.constant 0 : index
    %31 = tpu.strided_load %arg0[%c8_25, %c0_26] {strides = array<i32: 4, 1>} : memref<505x4xf32, #tpu.memory_space<vmem>>, vector<125x4xf32>
    %c32 = arith.constant 32 : index
    %c0_27 = arith.constant 0 : index
    %32 = vector.load %arg1[%c32, %c0_27] : memref<36x16xf32, #tpu.memory_space<vmem>>, vector<4x16xf32>
    %cst_28 = arith.constant dense<0.000000e+00> : vector<125x16xf32>
    %33 = tpu.matmul %31, %32, %cst_28 {dimension_numbers = #tpu.dot_dimension_numbers<[1], [0], [0], [1], [0, 0, 1, 1], [], []>} : vector<125x4xf32>, vector<4x16xf32>, vector<125x16xf32> -> vector<125x16xf32>
    %34 = arith.addf %30, %33 : vector<125x16xf32>
    %c0_29 = arith.constant 0 : index
    %c0_30 = arith.constant 0 : index
    %35 = vector.load %arg2[%c0_29, %c0_30] : memref<1x16xf32, #tpu.memory_space<vmem>>, vector<1x16xf32>
    %36 = vector.broadcast %35 : vector<1x16xf32> to vector<125x16xf32>
    %37 = arith.addf %34, %36 : vector<125x16xf32>
    %cst_31 = arith.constant 0.000000e+00 : f32
    %38 = vector.broadcast %cst_31 : f32 to vector<125x16xf32>
    %39 = arith.cmpf ogt, %37, %38 : vector<125x16xf32>
    %cst_32 = arith.constant 0.00999999977 : f32
    %40 = vector.broadcast %cst_32 : f32 to vector<125x16xf32>
    %41 = arith.mulf %40, %37 : vector<125x16xf32>
    %42 = arith.select %39, %37, %41 : vector<125x16xi1>, vector<125x16xf32>
    %cst_33 = arith.constant dense<0.000000e+00> : vector<16xf32>
    %43 = vector.multi_reduction <add>, %42, %cst_33 [0] : vector<125x16xf32> to vector<16xf32>
    %44 = vector.shape_cast %43 : vector<16xf32> to vector<1x16xf32>
    %45 = arith.mulf %42, %42 : vector<125x16xf32>
    %cst_34 = arith.constant dense<0.000000e+00> : vector<16xf32>
    %46 = vector.multi_reduction <add>, %45, %cst_34 [0] : vector<125x16xf32> to vector<16xf32>
    %47 = vector.shape_cast %46 : vector<16xf32> to vector<1x16xf32>
    %48 = tpu.concatenate %44, %47 in 0 : vector<1x16xf32>, vector<1x16xf32> -> vector<2x16xf32>
    %c0_35 = arith.constant 0 : index
    %c0_36 = arith.constant 0 : index
    %49 = vector.load %arg5[%c0_35, %c0_36] : memref<16x8xf32, #tpu.memory_space<vmem>>, vector<16x8xf32>
    %cst_37 = arith.constant dense<0.000000e+00> : vector<2x8xf32>
    %50 = tpu.matmul %48, %49, %cst_37 {dimension_numbers = #tpu.dot_dimension_numbers<[1], [0], [0], [1], [0, 0, 1, 1], [], []>} : vector<2x16xf32>, vector<16x8xf32>, vector<2x8xf32> -> vector<2x8xf32>
    %51 = vector.extract_strided_slice %50 {offsets = [0, 0], sizes = [1, 8], strides = [1, 1]} : vector<2x8xf32> to vector<1x8xf32>
    %cst_38 = arith.constant 4.000000e-03 : f32
    %52 = vector.broadcast %cst_38 : f32 to vector<1x8xf32>
    %53 = arith.mulf %51, %52 : vector<1x8xf32>
    %54 = vector.extract_strided_slice %50 {offsets = [1, 0], sizes = [1, 8], strides = [1, 1]} : vector<2x8xf32> to vector<1x8xf32>
    %cst_39 = arith.constant 4.000000e-03 : f32
    %55 = vector.broadcast %cst_39 : f32 to vector<1x8xf32>
    %56 = arith.mulf %54, %55 : vector<1x8xf32>
    %57 = arith.mulf %53, %53 : vector<1x8xf32>
    %58 = arith.subf %56, %57 : vector<1x8xf32>
    %cst_40 = arith.constant 0.000000e+00 : f32
    %59 = vector.broadcast %cst_40 : f32 to vector<1x8xf32>
    %60 = arith.maximumf %58, %59 : vector<1x8xf32>
    %c0_41 = arith.constant 0 : index
    %c0_42 = arith.constant 0 : index
    %61 = vector.load %arg3[%c0_41, %c0_42] : memref<1x8xf32, #tpu.memory_space<vmem>>, vector<1x8xf32>
    %cst_43 = arith.constant 9.99999974E-6 : f32
    %62 = vector.broadcast %cst_43 : f32 to vector<1x8xf32>
    %63 = arith.addf %60, %62 : vector<1x8xf32>
    %64 = math.rsqrt %63 : vector<1x8xf32>
    %65 = arith.mulf %61, %64 : vector<1x8xf32>
    %c0_44 = arith.constant 0 : index
    %c0_45 = arith.constant 0 : index
    %66 = vector.load %arg4[%c0_44, %c0_45] : memref<1x8xf32, #tpu.memory_space<vmem>>, vector<1x8xf32>
    %67 = arith.mulf %53, %65 : vector<1x8xf32>
    %68 = arith.subf %66, %67 : vector<1x8xf32>
    %69 = tpu.concatenate %65, %68 in 0 : vector<1x8xf32>, vector<1x8xf32> -> vector<2x8xf32>
    %c0_46 = arith.constant 0 : index
    %c0_47 = arith.constant 0 : index
    %70 = vector.load %arg6[%c0_46, %c0_47] : memref<8x16xf32, #tpu.memory_space<vmem>>, vector<8x16xf32>
    %cst_48 = arith.constant dense<0.000000e+00> : vector<2x16xf32>
    %71 = tpu.matmul %69, %70, %cst_48 {dimension_numbers = #tpu.dot_dimension_numbers<[1], [0], [0], [1], [0, 0, 1, 1], [], []>} : vector<2x8xf32>, vector<8x16xf32>, vector<2x16xf32> -> vector<2x16xf32>
    %72 = vector.extract_strided_slice %71 {offsets = [0, 0], sizes = [1, 16], strides = [1, 1]} : vector<2x16xf32> to vector<1x16xf32>
    %73 = vector.broadcast %72 : vector<1x16xf32> to vector<125x16xf32>
    %74 = arith.mulf %42, %73 : vector<125x16xf32>
    %75 = vector.extract_strided_slice %71 {offsets = [1, 0], sizes = [1, 16], strides = [1, 1]} : vector<2x16xf32> to vector<1x16xf32>
    %76 = vector.broadcast %75 : vector<1x16xf32> to vector<125x16xf32>
    %77 = arith.addf %74, %76 : vector<125x16xf32>
    %c0_49 = arith.constant 0 : index
    %c0_50 = arith.constant 0 : index
    %78 = vector.load %arg26[%c0_49, %c0_50] : memref<125x16xf32, #tpu.memory_space<vmem>>, vector<125x16xf32>
    tpu.vector_store %arg26[%c0_49, %c0_50], %77 {strides = array<i32>} : memref<125x16xf32, #tpu.memory_space<vmem>>, vector<125x16xf32>,
    %c0_51 = arith.constant 0 : index
    %c0_52 = arith.constant 0 : index
    %79 = tpu.strided_load %arg26[%c0_51, %c0_52] {strides = array<i32: 3, 1>} : memref<125x16xf32, #tpu.memory_space<vmem>>, vector<40x16xf32>
    %c0_53 = arith.constant 0 : index
    %c0_54 = arith.constant 0 : index
    %80 = vector.load %arg7[%c0_53, %c0_54] : memref<112x8xf32, #tpu.memory_space<vmem>>, vector<16x8xf32>
    %cst_55 = arith.constant dense<0.000000e+00> : vector<40x8xf32>
    %81 = tpu.matmul %79, %80, %cst_55 {dimension_numbers = #tpu.dot_dimension_numbers<[1], [0], [0], [1], [0, 0, 1, 1], [], []>} : vector<40x16xf32>, vector<16x8xf32>, vector<40x8xf32> -> vector<40x8xf32>
    %c1_56 = arith.constant 1 : index
    %c0_57 = arith.constant 0 : index
    %82 = tpu.strided_load %arg26[%c1_56, %c0_57] {strides = array<i32: 3, 1>} : memref<125x16xf32, #tpu.memory_space<vmem>>, vector<40x16xf32>
    %c16_58 = arith.constant 16 : index
    %c0_59 = arith.constant 0 : index
    %83 = vector.load %arg7[%c16_58, %c0_59] : memref<112x8xf32, #tpu.memory_space<vmem>>, vector<16x8xf32>
    %cst_60 = arith.constant dense<0.000000e+00> : vector<40x8xf32>
    %84 = tpu.matmul %82, %83, %cst_60 {dimension_numbers = #tpu.dot_dimension_numbers<[1], [0], [0], [1], [0, 0, 1, 1], [], []>} : vector<40x16xf32>, vector<16x8xf32>, vector<40x8xf32> -> vector<40x8xf32>
    %85 = arith.addf %81, %84 : vector<40x8xf32>
    %c2_61 = arith.constant 2 : index
    %c0_62 = arith.constant 0 : index
    %86 = tpu.strided_load %arg26[%c2_61, %c0_62] {strides = array<i32: 3, 1>} : memref<125x16xf32, #tpu.memory_space<vmem>>, vector<40x16xf32>
    %c32_63 = arith.constant 32 : index
    %c0_64 = arith.constant 0 : index
    %87 = vector.load %arg7[%c32_63, %c0_64] : memref<112x8xf32, #tpu.memory_space<vmem>>, vector<16x8xf32>
    %cst_65 = arith.constant dense<0.000000e+00> : vector<40x8xf32>
    %88 = tpu.matmul %86, %87, %cst_65 {dimension_numbers = #tpu.dot_dimension_numbers<[1], [0], [0], [1], [0, 0, 1, 1], [], []>} : vector<40x16xf32>, vector<16x8xf32>, vector<40x8xf32> -> vector<40x8xf32>
    %89 = arith.addf %85, %88 : vector<40x8xf32>
    %c3_66 = arith.constant 3 : index
    %c0_67 = arith.constant 0 : index
    %90 = tpu.strided_load %arg26[%c3_66, %c0_67] {strides = array<i32: 3, 1>} : memref<125x16xf32, #tpu.memory_space<vmem>>, vector<40x16xf32>
    %c48 = arith.constant 48 : index
    %c0_68 = arith.constant 0 : index
    %91 = vector.load %arg7[%c48, %c0_68] : memref<112x8xf32, #tpu.memory_space<vmem>>, vector<16x8xf32>
    %cst_69 = arith.constant dense<0.000000e+00> : vector<40x8xf32>
    %92 = tpu.matmul %90, %91, %cst_69 {dimension_numbers = #tpu.dot_dimension_numbers<[1], [0], [0], [1], [0, 0, 1, 1], [], []>} : vector<40x16xf32>, vector<16x8xf32>, vector<40x8xf32> -> vector<40x8xf32>
    %93 = arith.addf %89, %92 : vector<40x8xf32>
    %c4_70 = arith.constant 4 : index
    %c0_71 = arith.constant 0 : index
    %94 = tpu.strided_load %arg26[%c4_70, %c0_71] {strides = array<i32: 3, 1>} : memref<125x16xf32, #tpu.memory_space<vmem>>, vector<40x16xf32>
    %c64 = arith.constant 64 : index
    %c0_72 = arith.constant 0 : index
    %95 = vector.load %arg7[%c64, %c0_72] : memref<112x8xf32, #tpu.memory_space<vmem>>, vector<16x8xf32>
    %cst_73 = arith.constant dense<0.000000e+00> : vector<40x8xf32>
    %96 = tpu.matmul %94, %95, %cst_73 {dimension_numbers = #tpu.dot_dimension_numbers<[1], [0], [0], [1], [0, 0, 1, 1], [], []>} : vector<40x16xf32>, vector<16x8xf32>, vector<40x8xf32> -> vector<40x8xf32>
    %97 = arith.addf %93, %96 : vector<40x8xf32>
    %c5_74 = arith.constant 5 : index
    %c0_75 = arith.constant 0 : index
    %98 = tpu.strided_load %arg26[%c5_74, %c0_75] {strides = array<i32: 3, 1>} : memref<125x16xf32, #tpu.memory_space<vmem>>, vector<40x16xf32>
    %c80 = arith.constant 80 : index
    %c0_76 = arith.constant 0 : index
    %99 = vector.load %arg7[%c80, %c0_76] : memref<112x8xf32, #tpu.memory_space<vmem>>, vector<16x8xf32>
    %cst_77 = arith.constant dense<0.000000e+00> : vector<40x8xf32>
    %100 = tpu.matmul %98, %99, %cst_77 {dimension_numbers = #tpu.dot_dimension_numbers<[1], [0], [0], [1], [0, 0, 1, 1], [], []>} : vector<40x16xf32>, vector<16x8xf32>, vector<40x8xf32> -> vector<40x8xf32>
    %101 = arith.addf %97, %100 : vector<40x8xf32>
    %c6_78 = arith.constant 6 : index
    %c0_79 = arith.constant 0 : index
    %102 = tpu.strided_load %arg26[%c6_78, %c0_79] {strides = array<i32: 3, 1>} : memref<125x16xf32, #tpu.memory_space<vmem>>, vector<40x16xf32>
    %c96 = arith.constant 96 : index
    %c0_80 = arith.constant 0 : index
    %103 = vector.load %arg7[%c96, %c0_80] : memref<112x8xf32, #tpu.memory_space<vmem>>, vector<16x8xf32>
    %cst_81 = arith.constant dense<0.000000e+00> : vector<40x8xf32>
    %104 = tpu.matmul %102, %103, %cst_81 {dimension_numbers = #tpu.dot_dimension_numbers<[1], [0], [0], [1], [0, 0, 1, 1], [], []>} : vector<40x16xf32>, vector<16x8xf32>, vector<40x8xf32> -> vector<40x8xf32>
    %105 = arith.addf %101, %104 : vector<40x8xf32>
    %c0_82 = arith.constant 0 : index
    %c0_83 = arith.constant 0 : index
    %106 = vector.load %arg8[%c0_82, %c0_83] : memref<1x8xf32, #tpu.memory_space<vmem>>, vector<1x8xf32>
    %107 = vector.broadcast %106 : vector<1x8xf32> to vector<40x8xf32>
    %108 = arith.addf %105, %107 : vector<40x8xf32>
    %cst_84 = arith.constant 0.000000e+00 : f32
    %109 = vector.broadcast %cst_84 : f32 to vector<40x8xf32>
    %110 = arith.cmpf ogt, %108, %109 : vector<40x8xf32>
    %cst_85 = arith.constant 0.00999999977 : f32
    %111 = vector.broadcast %cst_85 : f32 to vector<40x8xf32>
    %112 = arith.mulf %111, %108 : vector<40x8xf32>
    %113 = arith.select %110, %108, %112 : vector<40x8xi1>, vector<40x8xf32>
    %cst_86 = arith.constant dense<0.000000e+00> : vector<8xf32>
    %114 = vector.multi_reduction <add>, %113, %cst_86 [0] : vector<40x8xf32> to vector<8xf32>
    %115 = vector.shape_cast %114 : vector<8xf32> to vector<1x8xf32>
    %116 = arith.mulf %113, %113 : vector<40x8xf32>
    %cst_87 = arith.constant dense<0.000000e+00> : vector<8xf32>
    %117 = vector.multi_reduction <add>, %116, %cst_87 [0] : vector<40x8xf32> to vector<8xf32>
    %118 = vector.shape_cast %117 : vector<8xf32> to vector<1x8xf32>
    %119 = tpu.concatenate %115, %118 in 0 : vector<1x8xf32>, vector<1x8xf32> -> vector<2x8xf32>
    %c0_88 = arith.constant 0 : index
    %c0_89 = arith.constant 0 : index
    %120 = vector.load %arg11[%c0_88, %c0_89] : memref<8x4xf32, #tpu.memory_space<vmem>>, vector<8x4xf32>
    %cst_90 = arith.constant dense<0.000000e+00> : vector<2x4xf32>
    %121 = tpu.matmul %119, %120, %cst_90 {dimension_numbers = #tpu.dot_dimension_numbers<[1], [0], [0], [1], [0, 0, 1, 1], [], []>} : vector<2x8xf32>, vector<8x4xf32>, vector<2x4xf32> -> vector<2x4xf32>
    %122 = vector.extract_strided_slice %121 {offsets = [0, 0], sizes = [1, 4], strides = [1, 1]} : vector<2x4xf32> to vector<1x4xf32>
    %cst_91 = arith.constant 1.250000e-02 : f32
    %123 = vector.broadcast %cst_91 : f32 to vector<1x4xf32>
    %124 = arith.mulf %122, %123 : vector<1x4xf32>
    %125 = vector.extract_strided_slice %121 {offsets = [1, 0], sizes = [1, 4], strides = [1, 1]} : vector<2x4xf32> to vector<1x4xf32>
    %cst_92 = arith.constant 1.250000e-02 : f32
    %126 = vector.broadcast %cst_92 : f32 to vector<1x4xf32>
    %127 = arith.mulf %125, %126 : vector<1x4xf32>
    %128 = arith.mulf %124, %124 : vector<1x4xf32>
    %129 = arith.subf %127, %128 : vector<1x4xf32>
    %cst_93 = arith.constant 0.000000e+00 : f32
    %130 = vector.broadcast %cst_93 : f32 to vector<1x4xf32>
    %131 = arith.maximumf %129, %130 : vector<1x4xf32>
    %c0_94 = arith.constant 0 : index
    %c0_95 = arith.constant 0 : index
    %132 = vector.load %arg9[%c0_94, %c0_95] : memref<1x4xf32, #tpu.memory_space<vmem>>, vector<1x4xf32>
    %cst_96 = arith.constant 9.99999974E-6 : f32
    %133 = vector.broadcast %cst_96 : f32 to vector<1x4xf32>
    %134 = arith.addf %131, %133 : vector<1x4xf32>
    %135 = math.rsqrt %134 : vector<1x4xf32>
    %136 = arith.mulf %132, %135 : vector<1x4xf32>
    %c0_97 = arith.constant 0 : index
    %c0_98 = arith.constant 0 : index
    %137 = vector.load %arg10[%c0_97, %c0_98] : memref<1x4xf32, #tpu.memory_space<vmem>>, vector<1x4xf32>
    %138 = arith.mulf %124, %136 : vector<1x4xf32>
    %139 = arith.subf %137, %138 : vector<1x4xf32>
    %140 = tpu.concatenate %136, %139 in 0 : vector<1x4xf32>, vector<1x4xf32> -> vector<2x4xf32>
    %c0_99 = arith.constant 0 : index
    %c0_100 = arith.constant 0 : index
    %141 = vector.load %arg12[%c0_99, %c0_100] : memref<4x8xf32, #tpu.memory_space<vmem>>, vector<4x8xf32>
    %cst_101 = arith.constant dense<0.000000e+00> : vector<2x8xf32>
    %142 = tpu.matmul %140, %141, %cst_101 {dimension_numbers = #tpu.dot_dimension_numbers<[1], [0], [0], [1], [0, 0, 1, 1], [], []>} : vector<2x4xf32>, vector<4x8xf32>, vector<2x8xf32> -> vector<2x8xf32>
    %143 = vector.extract_strided_slice %142 {offsets = [0, 0], sizes = [1, 8], strides = [1, 1]} : vector<2x8xf32> to vector<1x8xf32>
    %144 = vector.broadcast %143 : vector<1x8xf32> to vector<40x8xf32>
    %145 = arith.mulf %113, %144 : vector<40x8xf32>
    %146 = vector.extract_strided_slice %142 {offsets = [1, 0], sizes = [1, 8], strides = [1, 1]} : vector<2x8xf32> to vector<1x8xf32>
    %147 = vector.broadcast %146 : vector<1x8xf32> to vector<40x8xf32>
    %148 = arith.addf %145, %147 : vector<40x8xf32>
    %c0_102 = arith.constant 0 : index
    %c0_103 = arith.constant 0 : index
    %149 = vector.load %arg27[%c0_102, %c0_103] : memref<40x8xf32, #tpu.memory_space<vmem>>, vector<40x8xf32>
    tpu.vector_store %arg27[%c0_102, %c0_103], %148 {strides = array<i32>} : memref<40x8xf32, #tpu.memory_space<vmem>>, vector<40x8xf32>,
    %c0_104 = arith.constant 0 : index
    %c0_105 = arith.constant 0 : index
    %150 = tpu.strided_load %arg27[%c0_104, %c0_105] {strides = array<i32: 2, 1>} : memref<40x8xf32, #tpu.memory_space<vmem>>, vector<18x8xf32>
    %c0_106 = arith.constant 0 : index
    %c0_107 = arith.constant 0 : index
    %151 = vector.load %arg13[%c0_106, %c0_107] : memref<40x4xf32, #tpu.memory_space<vmem>>, vector<8x4xf32>
    %cst_108 = arith.constant dense<0.000000e+00> : vector<18x4xf32>
    %152 = tpu.matmul %150, %151, %cst_108 {dimension_numbers = #tpu.dot_dimension_numbers<[1], [0], [0], [1], [0, 0, 1, 1], [], []>} : vector<18x8xf32>, vector<8x4xf32>, vector<18x4xf32> -> vector<18x4xf32>
    %c1_109 = arith.constant 1 : index
    %c0_110 = arith.constant 0 : index
    %153 = tpu.strided_load %arg27[%c1_109, %c0_110] {strides = array<i32: 2, 1>} : memref<40x8xf32, #tpu.memory_space<vmem>>, vector<18x8xf32>
    %c8_111 = arith.constant 8 : index
    %c0_112 = arith.constant 0 : index
    %154 = vector.load %arg13[%c8_111, %c0_112] : memref<40x4xf32, #tpu.memory_space<vmem>>, vector<8x4xf32>
    %cst_113 = arith.constant dense<0.000000e+00> : vector<18x4xf32>
    %155 = tpu.matmul %153, %154, %cst_113 {dimension_numbers = #tpu.dot_dimension_numbers<[1], [0], [0], [1], [0, 0, 1, 1], [], []>} : vector<18x8xf32>, vector<8x4xf32>, vector<18x4xf32> -> vector<18x4xf32>
    %156 = arith.addf %152, %155 : vector<18x4xf32>
    %c2_114 = arith.constant 2 : index
    %c0_115 = arith.constant 0 : index
    %157 = tpu.strided_load %arg27[%c2_114, %c0_115] {strides = array<i32: 2, 1>} : memref<40x8xf32, #tpu.memory_space<vmem>>, vector<18x8xf32>
    %c16_116 = arith.constant 16 : index
    %c0_117 = arith.constant 0 : index
    %158 = vector.load %arg13[%c16_116, %c0_117] : memref<40x4xf32, #tpu.memory_space<vmem>>, vector<8x4xf32>
    %cst_118 = arith.constant dense<0.000000e+00> : vector<18x4xf32>
    %159 = tpu.matmul %157, %158, %cst_118 {dimension_numbers = #tpu.dot_dimension_numbers<[1], [0], [0], [1], [0, 0, 1, 1], [], []>} : vector<18x8xf32>, vector<8x4xf32>, vector<18x4xf32> -> vector<18x4xf32>
    %160 = arith.addf %156, %159 : vector<18x4xf32>
    %c3_119 = arith.constant 3 : index
    %c0_120 = arith.constant 0 : index
    %161 = tpu.strided_load %arg27[%c3_119, %c0_120] {strides = array<i32: 2, 1>} : memref<40x8xf32, #tpu.memory_space<vmem>>, vector<18x8xf32>
    %c24_121 = arith.constant 24 : index
    %c0_122 = arith.constant 0 : index
    %162 = vector.load %arg13[%c24_121, %c0_122] : memref<40x4xf32, #tpu.memory_space<vmem>>, vector<8x4xf32>
    %cst_123 = arith.constant dense<0.000000e+00> : vector<18x4xf32>
    %163 = tpu.matmul %161, %162, %cst_123 {dimension_numbers = #tpu.dot_dimension_numbers<[1], [0], [0], [1], [0, 0, 1, 1], [], []>} : vector<18x8xf32>, vector<8x4xf32>, vector<18x4xf32> -> vector<18x4xf32>
    %164 = arith.addf %160, %163 : vector<18x4xf32>
    %c4_124 = arith.constant 4 : index
    %c0_125 = arith.constant 0 : index
    %165 = tpu.strided_load %arg27[%c4_124, %c0_125] {strides = array<i32: 2, 1>} : memref<40x8xf32, #tpu.memory_space<vmem>>, vector<18x8xf32>
    %c32_126 = arith.constant 32 : index
    %c0_127 = arith.constant 0 : index
    %166 = vector.load %arg13[%c32_126, %c0_127] : memref<40x4xf32, #tpu.memory_space<vmem>>, vector<8x4xf32>
    %cst_128 = arith.constant dense<0.000000e+00> : vector<18x4xf32>
    %167 = tpu.matmul %165, %166, %cst_128 {dimension_numbers = #tpu.dot_dimension_numbers<[1], [0], [0], [1], [0, 0, 1, 1], [], []>} : vector<18x8xf32>, vector<8x4xf32>, vector<18x4xf32> -> vector<18x4xf32>
    %168 = arith.addf %164, %167 : vector<18x4xf32>
    %c0_129 = arith.constant 0 : index
    %c0_130 = arith.constant 0 : index
    %169 = vector.load %arg14[%c0_129, %c0_130] : memref<1x4xf32, #tpu.memory_space<vmem>>, vector<1x4xf32>
    %170 = vector.broadcast %169 : vector<1x4xf32> to vector<18x4xf32>
    %171 = arith.addf %168, %170 : vector<18x4xf32>
    %cst_131 = arith.constant 0.000000e+00 : f32
    %172 = vector.broadcast %cst_131 : f32 to vector<18x4xf32>
    %173 = arith.cmpf ogt, %171, %172 : vector<18x4xf32>
    %cst_132 = arith.constant 0.00999999977 : f32
    %174 = vector.broadcast %cst_132 : f32 to vector<18x4xf32>
    %175 = arith.mulf %174, %171 : vector<18x4xf32>
    %176 = arith.select %173, %171, %175 : vector<18x4xi1>, vector<18x4xf32>
    %cst_133 = arith.constant dense<0.000000e+00> : vector<4xf32>
    %177 = vector.multi_reduction <add>, %176, %cst_133 [0] : vector<18x4xf32> to vector<4xf32>
    %178 = vector.shape_cast %177 : vector<4xf32> to vector<1x4xf32>
    %179 = arith.mulf %176, %176 : vector<18x4xf32>
    %cst_134 = arith.constant dense<0.000000e+00> : vector<4xf32>
    %180 = vector.multi_reduction <add>, %179, %cst_134 [0] : vector<18x4xf32> to vector<4xf32>
    %181 = vector.shape_cast %180 : vector<4xf32> to vector<1x4xf32>
    %182 = tpu.concatenate %178, %181 in 0 : vector<1x4xf32>, vector<1x4xf32> -> vector<2x4xf32>
    %c0_135 = arith.constant 0 : index
    %c0_136 = arith.constant 0 : index
    %183 = vector.load %arg17[%c0_135, %c0_136] : memref<4x2xf32, #tpu.memory_space<vmem>>, vector<4x2xf32>
    %cst_137 = arith.constant dense<0.000000e+00> : vector<2x2xf32>
    %184 = tpu.matmul %182, %183, %cst_137 {dimension_numbers = #tpu.dot_dimension_numbers<[1], [0], [0], [1], [0, 0, 1, 1], [], []>} : vector<2x4xf32>, vector<4x2xf32>, vector<2x2xf32> -> vector<2x2xf32>
    %185 = vector.extract_strided_slice %184 {offsets = [0, 0], sizes = [1, 2], strides = [1, 1]} : vector<2x2xf32> to vector<1x2xf32>
    %cst_138 = arith.constant 0.027777778 : f32
    %186 = vector.broadcast %cst_138 : f32 to vector<1x2xf32>
    %187 = arith.mulf %185, %186 : vector<1x2xf32>
    %188 = vector.extract_strided_slice %184 {offsets = [1, 0], sizes = [1, 2], strides = [1, 1]} : vector<2x2xf32> to vector<1x2xf32>
    %cst_139 = arith.constant 0.027777778 : f32
    %189 = vector.broadcast %cst_139 : f32 to vector<1x2xf32>
    %190 = arith.mulf %188, %189 : vector<1x2xf32>
    %191 = arith.mulf %187, %187 : vector<1x2xf32>
    %192 = arith.subf %190, %191 : vector<1x2xf32>
    %cst_140 = arith.constant 0.000000e+00 : f32
    %193 = vector.broadcast %cst_140 : f32 to vector<1x2xf32>
    %194 = arith.maximumf %192, %193 : vector<1x2xf32>
    %c0_141 = arith.constant 0 : index
    %c0_142 = arith.constant 0 : index
    %195 = vector.load %arg15[%c0_141, %c0_142] : memref<1x2xf32, #tpu.memory_space<vmem>>, vector<1x2xf32>
    %cst_143 = arith.constant 9.99999974E-6 : f32
    %196 = vector.broadcast %cst_143 : f32 to vector<1x2xf32>
    %197 = arith.addf %194, %196 : vector<1x2xf32>
    %198 = math.rsqrt %197 : vector<1x2xf32>
    %199 = arith.mulf %195, %198 : vector<1x2xf32>
    %c0_144 = arith.constant 0 : index
    %c0_145 = arith.constant 0 : index
    %200 = vector.load %arg16[%c0_144, %c0_145] : memref<1x2xf32, #tpu.memory_space<vmem>>, vector<1x2xf32>
    %201 = arith.mulf %187, %199 : vector<1x2xf32>
    %202 = arith.subf %200, %201 : vector<1x2xf32>
    %203 = tpu.concatenate %199, %202 in 0 : vector<1x2xf32>, vector<1x2xf32> -> vector<2x2xf32>
    %c0_146 = arith.constant 0 : index
    %c0_147 = arith.constant 0 : index
    %204 = vector.load %arg18[%c0_146, %c0_147] : memref<2x4xf32, #tpu.memory_space<vmem>>, vector<2x4xf32>
    %cst_148 = arith.constant dense<0.000000e+00> : vector<2x4xf32>
    %205 = tpu.matmul %203, %204, %cst_148 {dimension_numbers = #tpu.dot_dimension_numbers<[1], [0], [0], [1], [0, 0, 1, 1], [], []>} : vector<2x2xf32>, vector<2x4xf32>, vector<2x4xf32> -> vector<2x4xf32>
    %206 = vector.extract_strided_slice %205 {offsets = [0, 0], sizes = [1, 4], strides = [1, 1]} : vector<2x4xf32> to vector<1x4xf32>
    %207 = vector.broadcast %206 : vector<1x4xf32> to vector<18x4xf32>
    %208 = arith.mulf %176, %207 : vector<18x4xf32>
    %209 = vector.extract_strided_slice %205 {offsets = [1, 0], sizes = [1, 4], strides = [1, 1]} : vector<2x4xf32> to vector<1x4xf32>
    %210 = vector.broadcast %209 : vector<1x4xf32> to vector<18x4xf32>
    %211 = arith.addf %208, %210 : vector<18x4xf32>
    %c0_149 = arith.constant 0 : index
    %c0_150 = arith.constant 0 : index
    %212 = vector.load %arg20[%c0_149, %c0_150] : memref<18x1xf32, #tpu.memory_space<vmem>>, vector<18x1xf32>
    %c0_151 = arith.constant 0 : index
    %c0_152 = arith.constant 0 : index
    %213 = vector.load %arg19[%c0_151, %c0_152] : memref<18x36xf32, #tpu.memory_space<vmem>>, vector<18x18xf32>
    %214 = vector.extract_strided_slice %211 {offsets = [0, 0], sizes = [18, 2], strides = [1, 1]} : vector<18x4xf32> to vector<18x2xf32>
    %cst_153 = arith.constant dense<0.000000e+00> : vector<18x2xf32>
    %215 = tpu.matmul %213, %214, %cst_153 {dimension_numbers = #tpu.dot_dimension_numbers<[1], [0], [0], [1], [0, 0, 1, 1], [], []>} : vector<18x18xf32>, vector<18x2xf32>, vector<18x2xf32> -> vector<18x2xf32>
    %216 = vector.broadcast %212 : vector<18x1xf32> to vector<18x2xf32>
    %217 = arith.addf %216, %215 : vector<18x2xf32>
    %c0_154 = arith.constant 0 : index
    %c18 = arith.constant 18 : index
    %218 = vector.load %arg19[%c0_154, %c18] : memref<18x36xf32, #tpu.memory_space<vmem>>, vector<18x18xf32>
    %219 = vector.extract_strided_slice %211 {offsets = [0, 2], sizes = [18, 2], strides = [1, 1]} : vector<18x4xf32> to vector<18x2xf32>
    %cst_155 = arith.constant dense<0.000000e+00> : vector<18x2xf32>
    %220 = tpu.matmul %218, %219, %cst_155 {dimension_numbers = #tpu.dot_dimension_numbers<[1], [0], [0], [1], [0, 0, 1, 1], [], []>} : vector<18x18xf32>, vector<18x2xf32>, vector<18x2xf32> -> vector<18x2xf32>
    %221 = arith.addf %217, %220 : vector<18x2xf32>
    %cst_156 = arith.constant 0.000000e+00 : f32
    %222 = vector.broadcast %cst_156 : f32 to vector<18x2xf32>
    %223 = arith.cmpf ogt, %221, %222 : vector<18x2xf32>
    %cst_157 = arith.constant 0.00999999977 : f32
    %224 = vector.broadcast %cst_157 : f32 to vector<18x2xf32>
    %225 = arith.mulf %224, %221 : vector<18x2xf32>
    %226 = arith.select %223, %221, %225 : vector<18x2xi1>, vector<18x2xf32>
    %c0_158 = arith.constant 0 : index
    %c0_159 = arith.constant 0 : index
    %227 = vector.load %arg21[%c0_158, %c0_159] : memref<9x18xf32, #tpu.memory_space<vmem>>, vector<9x18xf32>
    %cst_160 = arith.constant dense<0.000000e+00> : vector<9x2xf32>
    %228 = tpu.matmul %227, %226, %cst_160 {dimension_numbers = #tpu.dot_dimension_numbers<[1], [0], [0], [1], [0, 0, 1, 1], [], []>} : vector<9x18xf32>, vector<18x2xf32>, vector<9x2xf32> -> vector<9x2xf32>
    %c0_161 = arith.constant 0 : index
    %c0_162 = arith.constant 0 : index
    %229 = vector.load %arg22[%c0_161, %c0_162] : memref<9x1xf32, #tpu.memory_space<vmem>>, vector<9x1xf32>
    %230 = vector.broadcast %229 : vector<9x1xf32> to vector<9x2xf32>
    %231 = arith.addf %228, %230 : vector<9x2xf32>
    %cst_163 = arith.constant 0.000000e+00 : f32
    %232 = vector.broadcast %cst_163 : f32 to vector<9x2xf32>
    %233 = arith.cmpf ogt, %231, %232 : vector<9x2xf32>
    %cst_164 = arith.constant 0.00999999977 : f32
    %234 = vector.broadcast %cst_164 : f32 to vector<9x2xf32>
    %235 = arith.mulf %234, %231 : vector<9x2xf32>
    %236 = arith.select %233, %231, %235 : vector<9x2xi1>, vector<9x2xf32>
    %c0_165 = arith.constant 0 : index
    %c0_166 = arith.constant 0 : index
    %237 = vector.load %arg23[%c0_165, %c0_166] : memref<2x9xf32, #tpu.memory_space<vmem>>, vector<2x9xf32>
    %cst_167 = arith.constant dense<0.000000e+00> : vector<2x2xf32>
    %238 = tpu.matmul %237, %236, %cst_167 {dimension_numbers = #tpu.dot_dimension_numbers<[1], [0], [0], [1], [0, 0, 1, 1], [], []>} : vector<2x9xf32>, vector<9x2xf32>, vector<2x2xf32> -> vector<2x2xf32>
    %c0_168 = arith.constant 0 : index
    %c0_169 = arith.constant 0 : index
    %239 = vector.load %arg24[%c0_168, %c0_169] : memref<2x1xf32, #tpu.memory_space<vmem>>, vector<2x1xf32>
    %240 = vector.broadcast %239 : vector<2x1xf32> to vector<2x2xf32>
    %241 = arith.addf %238, %240 : vector<2x2xf32>
    %cst_170 = arith.constant 0.000000e+00 : f32
    %242 = vector.broadcast %cst_170 : f32 to vector<2x2xf32>
    %243 = arith.subf %242, %241 : vector<2x2xf32>
    %244 = math.exp %243 : vector<2x2xf32>
    %cst_171 = arith.constant 1.000000e+00 : f32
    %245 = vector.broadcast %cst_171 : f32 to vector<2x2xf32>
    %246 = arith.addf %245, %244 : vector<2x2xf32>
    %247 = tpu.reciprocal %246 {approx = true} : vector<2x2xf32> -> vector<2x2xf32>
    %c0_172 = arith.constant 0 : index
    %c0_173 = arith.constant 0 : index
    %248 = vector.load %arg25[%c0_172, %c0_173] : memref<2x2xf32, #tpu.memory_space<vmem>>, vector<2x2xf32>
    tpu.vector_store %arg25[%c0_172, %c0_173], %247 {strides = array<i32>} : memref<2x2xf32, #tpu.memory_space<vmem>>, vector<2x2xf32>,
    return
  }
}

</mosaic_0001>

<bundles_post_ra>
// kernel: forward.1
= control target key start
LH: loop header
LB: loop body
LE: loop exit
PB: predicated region body
PF: predicated region fallthrough
CT: control target
= control target key end

     0   :  { %vm194_vm0 = vcmask 1043456   ;;  %vm145_vm1 = vcmask 31744   ;;  %vm6284_vm2 = vmmov 0   ;;  %vm2325_vm4 = vcmask 130048   ;;  %s7679_s1 = inlined_call_operand.vmem [shape: f32[36,16], index: 1, kind: input, shape index: {}]   ;;  %s7680_s0 = inlined_call_operand.vmem [shape: f32[505,4], index: 0, kind: input, shape index: {}]   ;;  %s7681_s5 = inlined_call_operand.vmem [shape: f32[16,8], index: 5, kind: input, shape index: {}]   ;;  %s7682_s2 = inlined_call_operand.vmem [shape: f32[1,16], index: 2, kind: input, shape index: {}]   ;;  %s7683_s6 = inlined_call_operand.vmem [shape: f32[8,16], index: 6, kind: input, shape index: {}]   ;;  %s7684_s3 = inlined_call_operand.vmem [shape: f32[1,8], index: 3, kind: input, shape index: {}]   ;;  %s7685_s4 = inlined_call_operand.vmem [shape: f32[1,8], index: 4, kind: input, shape index: {}]   ;;  %s7686_s7 = inlined_call_operand.vmem [shape: f32[112,8], index: 7, kind: input, shape index: {}]   ;;  %s7687_s11 = inlined_call_operand.vmem [shape: f32[8,4], index: 11, kind: input, shape index: {}]   ;;  %s7688_s8 = inlined_call_operand.vmem [shape: f32[1,8], index: 8, kind: input, shape index: {}]   ;;  %s7689_s12 = inlined_call_operand.vmem [shape: f32[4,8], index: 12, kind: input, shape index: {}]   ;;  %s7690_s9 = inlined_call_operand.vmem [shape: f32[1,4], index: 9, kind: input, shape index: {}]   ;;  %s7691_s10 = inlined_call_operand.vmem [shape: f32[1,4], index: 10, kind: input, shape index: {}]   ;;  %s7692_s13 = inlined_call_operand.vmem [shape: f32[40,4], index: 13, kind: input, shape index: {}]   ;;  %s7693_s17 = inlined_call_operand.vmem [shape: f32[4,2], index: 17, kind: input, shape index: {}]   ;;  %s7694_s14 = inlined_call_operand.vmem [shape: f32[1,4], index: 14, kind: input, shape index: {}]   ;;  %s7695_s18 = inlined_call_operand.vmem [shape: f32[2,4], index: 18, kind: input, shape index: {}]   ;;  %s7696_s15 = inlined_call_operand.vmem [shape: f32[1,2], index: 15, kind: input, shape index: {}]   ;;  %s7697_s16 = inlined_call_operand.vmem [shape: f32[1,2], index: 16, kind: input, shape index: {}]   ;;  %s7698_s19 = inlined_call_operand.vmem [shape: f32[18,36], index: 19, kind: input, shape index: {}]   ;;  %s7699_s20 = inlined_call_operand.vmem [shape: f32[18,1], index: 20, kind: input, shape index: {}]   ;;  %s7700_s22 = inlined_call_operand.vmem [shape: f32[9,1], index: 22, kind: input, shape index: {}]   ;;  %s7701_s24 = inlined_call_operand.vmem [shape: f32[2,1], index: 24, kind: input, shape index: {}]   ;;  %s7702_s21 = inlined_call_operand.vmem [shape: f32[9,18], index: 21, kind: input, shape index: {}]   ;;  %s7703_s23 = inlined_call_operand.vmem [shape: f32[2,9], index: 23, kind: input, shape index: {}]   ;;  %s7704_s25 = inlined_call_operand.vmem [shape: f32[2,2], index: 25, kind: output, shape index: {}]  }
   0x1   :  { %7709 = sst [smem:[#allocation4_spill]] %s7679_s1 }
   0x2   :  { %7710 = sst [smem:[#allocation5_spill]] %s7680_s0 }
   0x3   :  { %7711 = sst [smem:[#allocation6_spill]] %s7681_s5  ;;  %s7719_s5 = sld [smem:[#allocation4_spill]] }
   0x4   :  { %7712 = sst [smem:[#allocation7_spill]] %s7682_s2  ;;  %s7720_s2 = sld [smem:[#allocation5_spill]] }
   0x5   :  { %7713 = sst [smem:[#allocation8_spill]] %s7683_s6 }
   0x6   :  { %7714 = sst [smem:[#allocation9_spill]] %s7684_s3  ;;  %s7723_s28 = sld [smem:[#allocation8_spill]] }
   0x7   :  { %7715 = sst [smem:[#allocation10_spill]] %s7685_s4  ;;  %s6287_s3 = smov 110  }
   0x8   :  { %7716 = sst [smem:[#allocation11_spill]] %s7686_s7  ;;  %s7725_s29 = sld [smem:[#allocation10_spill]] }
   0x9   :  { %7717 = sst [smem:[#allocation12_spill]] %s7687_s11  ;;  %v144_v0 = vld [vmem:[%s7719_s5 + $0x4] sm:$0xf]  ;;  %v111_v4 = vld [vmem:[%s7719_s5] sm:$0xf]  ;;  %s7722_s11 = sld [smem:[#allocation7_spill]] }
   0xa   :  { %7718 = sst [smem:[#allocation13_spill]] %s7688_s8  ;;  %v4970_v1 = vld [vmem:[%s7720_s2 + $0x1] ss:$4 sm:$0xff]  ;;  %5581 = vmatprep.subr.msk.mxu0 %vm194_vm0, %v144_v0  ;;  %6119 = vmatprep.subr.msk.mxu1 %vm194_vm0, %v144_v0  ;;  %v80_v13 = vld [vmem:[%s7720_s2] ss:$4 sm:$0xff]  ;;  %s7726_s7 = sld [smem:[#allocation11_spill]] }
   0xb   :  { %v4971_v2 = vld [vmem:[%s7720_s2 + $0x21] ss:$4 sm:$0xff]  ;;  %5583 = vmatprep.mubr.msk.f32.mxu0 %vm145_vm1, %v4970_v1  ;;  %5582 = vmatpush3.msk.msra.mxu0 %vm194_vm0, %v144_v0  ;;  %v4955_v14 = vld [vmem:[%s7720_s2 + $0x20] ss:$4 sm:$0xff]  ;;  %v5020_v30 = vld [vmem:[%s7720_s2 + $0x2] ss:$4 sm:$0xff] }
   0xc   :  { %v4972_v3 = vld [vmem:[%s7720_s2 + $0x41] ss:$4 sm:$0xff]  ;;  %5584 = vmatmul.mubr.msk.f32.vlgmr.msra.gmra.mrb[0].mxu0 %vm145_vm1, %v4971_v2  ;;  %5607 = vmatprep.subr.msk.mxu0 %vm194_vm0, %v111_v4  ;;  %v4956_v15 = vld [vmem:[%s7720_s2 + $0x40] ss:$4 sm:$0xff]  ;;  %v5021_v31 = vld [vmem:[%s7720_s2 + $0x22] ss:$4 sm:$0xff] }
   0xd   :  { %5586 = vmatprep.mubr.msk.f32.mxu0 %vm145_vm1, %v4972_v3  ;;  %v4973_v5 = vld [vmem:[%s7720_s2 + $0x61] ss:$4 sm:$0xff]  ;;  %5608 = vmatpush3.msk.msra.mxu0 %vm194_vm0, %v111_v4  ;;  %v4957_v17 = vld [vmem:[%s7720_s2 + $0x60] ss:$4 sm:$0xff]  ;;  %v5022_v32 = vld [vmem:[%s7720_s2 + $0x42] ss:$4 sm:$0xff] }
   0xe   :  { %v4974_v6 = vld [vmem:[%s7720_s2 + $0x81] ss:$4 sm:$0xff]  ;;  %6120 = vmatpush3.msk.msra.mxu1 %vm194_vm0, %v144_v0  ;;  %v4958_v18 = vld [vmem:[%s7720_s2 + $0x80] ss:$4 sm:$0xff]  ;;  %v5023_v34 = vld [vmem:[%s7720_s2 + $0x62] ss:$4 sm:$0xff] }
   0xf   :  { %v571_v7 = vld [vmem:[%s7719_s5 + $0x8] sm:$0xf]  ;;  %v816_v16 = vld [vmem:[%s7719_s5 + $0xc] sm:$0xf]  ;;  %v1061_v33 = vld [vmem:[%s7719_s5 + $0x10] sm:$0xf] }
  0x10   :  { %5633 = vmatprep.subr.msk.mxu0 %vm194_vm0, %v571_v7  ;;  %5587 = vmatmul.mubr.msk.f32.gmra.mrb[2].mxu0 %vm145_vm1, %v4973_v5  ;;  %v4975_v8 = vld [vmem:[%s7720_s2 + $0xa1] ss:$4 sm:$0xff]  ;;  %v4959_v19 = vld [vmem:[%s7720_s2 + $0xa0] ss:$4 sm:$0xff]  ;;  %v5024_v35 = vld [vmem:[%s7720_s2 + $0x82] ss:$4 sm:$0xff] }
  0x11   :  { %5589 = vmatprep.mubr.msk.f32.mxu0 %vm145_vm1, %v4974_v6  ;;  %v4976_v9 = vld [vmem:[%s7720_s2 + $0xc1] ss:$4 sm:$0xff]  ;;  %v4960_v20 = vld [vmem:[%s7720_s2 + $0xc0] ss:$4 sm:$0xff]  ;;  %v5025_v36 = vld [vmem:[%s7720_s2 + $0xa2] ss:$4 sm:$0xff] }
  0x12   :  { %v4977_v10 = vld [vmem:[%s7720_s2 + $0xe1] ss:$4 sm:$0xff]  ;;  %v4961_v21 = vld [vmem:[%s7720_s2 + $0xe0] ss:$4 sm:$0xff]  ;;  %v5026_v37 = vld [vmem:[%s7720_s2 + $0xc2] ss:$4 sm:$0xff] }
  0x13   :  { %v4978_v11 = vld [vmem:[%s7720_s2 + $0x101] ss:$4 sm:$0xff]  ;;  %v4962_v22 = vld [vmem:[%s7720_s2 + $0x100] ss:$4 sm:$0xff]  ;;  %v5027_v38 = vld [vmem:[%s7720_s2 + $0xe2] ss:$4 sm:$0xff] }
  0x14   :  { %5590 = vmatmul.mubr.msk.f32.gmra.mrb[4].mxu0 %vm145_vm1, %v4975_v8  ;;  %v4979_v12 = vld [vmem:[%s7720_s2 + $0x121] ss:$4 sm:$0xff]  ;;  %v4963_v23 = vld [vmem:[%s7720_s2 + $0x120] ss:$4 sm:$0xff]  ;;  %v5028_v39 = vld [vmem:[%s7720_s2 + $0x102] ss:$4 sm:$0xff] }
  0x15   :  { %5592 = vmatprep.mubr.msk.f32.mxu0 %vm145_vm1, %v4976_v9  ;;  %v4964_v24 = vld [vmem:[%s7720_s2 + $0x140] ss:$4 sm:$0xff]  ;;  %v5029_v40 = vld [vmem:[%s7720_s2 + $0x122] ss:$4 sm:$0xff]  ;;  %v5053_v47 = vld [vmem:[%s7720_s2 + $0x3] ss:$4 sm:$0xff] }
  0x16   :  { %v4965_v25 = vld [vmem:[%s7720_s2 + $0x160] ss:$4 sm:$0xff]  ;;  %v5030_v41 = vld [vmem:[%s7720_s2 + $0x142] ss:$4 sm:$0xff]  ;;  %v5054_v48 = vld [vmem:[%s7720_s2 + $0x23] ss:$4 sm:$0xff] }
  0x17   :  { %v4966_v26 = vld [vmem:[%s7720_s2 + $0x180] ss:$4 sm:$0xff]  ;;  %v5031_v42 = vld [vmem:[%s7720_s2 + $0x162] ss:$4 sm:$0xff]  ;;  %v5055_v49 = vld [vmem:[%s7720_s2 + $0x43] ss:$4 sm:$0xff] }
  0x18   :  { %5593 = vmatmul.mubr.msk.f32.gmra.mrb[6].mxu0 %vm145_vm1, %v4977_v10  ;;  %v4967_v27 = vld [vmem:[%s7720_s2 + $0x1a0] ss:$4 sm:$0xff]  ;;  %v5032_v43 = vld [vmem:[%s7720_s2 + $0x182] ss:$4 sm:$0xff]  ;;  %v5056_v51 = vld [vmem:[%s7720_s2 + $0x63] ss:$4 sm:$0xff] }
  0x19   :  { %5595 = vmatprep.mubr.msk.f32.mxu0 %vm145_vm1, %v4978_v11  ;;  %v4968_v28 = vld [vmem:[%s7720_s2 + $0x1c0] ss:$4 sm:$0xff]  ;;  %v5033_v44 = vld [vmem:[%s7720_s2 + $0x1a2] ss:$4 sm:$0xff]  ;;  %v5057_v52 = vld [vmem:[%s7720_s2 + $0x83] ss:$4 sm:$0xff] }
  0x1a   :  { %v4969_v29 = vld [vmem:[%s7720_s2 + $0x1e0] ss:$4 sm:$0x1f]  ;;  %v5034_v45 = vld [vmem:[%s7720_s2 + $0x1c2] ss:$4 sm:$0xff]  ;;  %s7727_s30 = sld [smem:[#allocation12_spill]] }
  0x1b   :  { %v5035_v46 = vld [vmem:[%s7720_s2 + $0x1e2] ss:$4 sm:$0x1f]  ;;  %v1306_v50 = vld [vmem:[%s7719_s5 + $0x14] sm:$0xf] }
  0x1c   :  { %5596 = vmatmul.mubr.msk.f32.gmra.mrb[8].mxu0 %vm145_vm1, %v4979_v12  ;;  %v5058_v53 = vld [vmem:[%s7720_s2 + $0xa3] ss:$4 sm:$0xff]  ;;  %v5086_v0 = vld [vmem:[%s7720_s2 + $0x4] ss:$4 sm:$0xff]  ;;  %v4980_v12 = vld [vmem:[%s7720_s2 + $0x141] ss:$4 sm:$0xff] }
  0x1d   :  { %5609 = vmatprep.mubr.msk.f32.mxu0 %vm145_vm1, %v80_v13  ;;  %v5059_v54 = vld [vmem:[%s7720_s2 + $0xc3] ss:$4 sm:$0xff]  ;;  %v5087_v1 = vld [vmem:[%s7720_s2 + $0x24] ss:$4 sm:$0xff]  ;;  %v4981_v13 = vld [vmem:[%s7720_s2 + $0x161] ss:$4 sm:$0xff]  ;;  %5598 = vmatprep.mubr.msk.f32.mxu1 %vm145_vm1, %v4980_v12 }
  0x1e   :  { %v5060_v55 = vld [vmem:[%s7720_s2 + $0xe3] ss:$4 sm:$0xff]  ;;  %v5088_v2 = vld [vmem:[%s7720_s2 + $0x44] ss:$4 sm:$0xff]  ;;  %5599 = vmatmul.mubr.msk.f32.vlgmr.msra.gmra.mrb[0].mxu1 %vm145_vm1, %v4981_v13 }
  0x1f   :  { %v5061_v56 = vld [vmem:[%s7720_s2 + $0x103] ss:$4 sm:$0xff]  ;;  %v5089_v4 = vld [vmem:[%s7720_s2 + $0x64] ss:$4 sm:$0xff] }
  0x20   :  { %5610 = vmatmul.mubr.msk.f32.vlgmr.msra.gmra.mrb[0].mxu0 %vm145_vm1, %v4955_v14  ;;  %v5062_v57 = vld [vmem:[%s7720_s2 + $0x123] ss:$4 sm:$0xff]  ;;  %v5090_v5 = vld [vmem:[%s7720_s2 + $0x84] ss:$4 sm:$0xff] }
  0x21   :  { %5612 = vmatprep.mubr.msk.f32.mxu0 %vm145_vm1, %v4956_v15  ;;  %5634 = vmatpush3.msk.msra.mxu0 %vm194_vm0, %v571_v7  ;;  %v5063_v58 = vld [vmem:[%s7720_s2 + $0x143] ss:$4 sm:$0xff]  ;;  %v5091_v6 = vld [vmem:[%s7720_s2 + $0xa4] ss:$4 sm:$0xff] }
  0x22   :  { %5659 = vmatprep.subr.msk.mxu0 %vm194_vm0, %v816_v16  ;;  %v5064_v59 = vld [vmem:[%s7720_s2 + $0x163] ss:$4 sm:$0xff]  ;;  %v5092_v7 = vld [vmem:[%s7720_s2 + $0xc4] ss:$4 sm:$0xff] }
  0x23   :  { %v5065_v60 = vld [vmem:[%s7720_s2 + $0x183] ss:$4 sm:$0xff]  ;;  %v5093_v8 = vld [vmem:[%s7720_s2 + $0xe4] ss:$4 sm:$0xff] }
  0x24   :  { %5613 = vmatmul.mubr.msk.f32.gmra.mrb[2].mxu0 %vm145_vm1, %v4957_v17  ;;  %v5066_v61 = vld [vmem:[%s7720_s2 + $0x1a3] ss:$4 sm:$0xff]  ;;  %v5094_v9 = vld [vmem:[%s7720_s2 + $0x104] ss:$4 sm:$0xff]  ;;  %v4983_v17 = vld [vmem:[%s7720_s2 + $0x1a1] ss:$4 sm:$0xff] }
  0x25   :  { %5615 = vmatprep.mubr.msk.f32.mxu0 %vm145_vm1, %v4958_v18  ;;  %v5067_v62 = vld [vmem:[%s7720_s2 + $0x1c3] ss:$4 sm:$0xff]  ;;  %v5095_v10 = vld [vmem:[%s7720_s2 + $0x124] ss:$4 sm:$0xff] }
  0x26   :  { %v5068_v63 = vld [vmem:[%s7720_s2 + $0x1e3] ss:$4 sm:$0x1f]  ;;  %v1551_v3 = vld [vmem:[%s7719_s5 + $0x18] sm:$0xf] }
  0x27   :  { %v5096_v11 = vld [vmem:[%s7720_s2 + $0x144] ss:$4 sm:$0xff] }
  0x28   :  { %5616 = vmatmul.mubr.msk.f32.gmra.mrb[4].mxu0 %vm145_vm1, %v4959_v19  ;;  %v5097_v14 = vld [vmem:[%s7720_s2 + $0x164] ss:$4 sm:$0xff] }
  0x29   :  { %5618 = vmatprep.mubr.msk.f32.mxu0 %vm145_vm1, %v4960_v20  ;;  %v5098_v15 = vld [vmem:[%s7720_s2 + $0x184] ss:$4 sm:$0xff]  ;;  %v4984_v20 = vld [vmem:[%s7720_s2 + $0x1c1] ss:$4 sm:$0xff] }
  0x2a   :  { %v5099_v18 = vld [vmem:[%s7720_s2 + $0x1a4] ss:$4 sm:$0xff] }
  0x2b   :  { %v5100_v19 = vld [vmem:[%s7720_s2 + $0x1c4] ss:$4 sm:$0xff] }
  0x2c   :  { %5619 = vmatmul.mubr.msk.f32.gmra.mrb[6].mxu0 %vm145_vm1, %v4961_v21  ;;  %v4985_v21 = vld [vmem:[%s7720_s2 + $0x1e1] ss:$4 sm:$0x1f]  ;;  %v5221_v12 = vld [vmem:[%s7720_s2 + $0x68] ss:$4 sm:$0xff] }
  0x2d   :  { %5621 = vmatprep.mubr.msk.f32.mxu0 %vm145_vm1, %v4962_v22  ;;  %v5101_v22 = vld [vmem:[%s7720_s2 + $0x1e4] ss:$4 sm:$0x1f] }
  0x2e   :  { %v5222_v13 = vld [vmem:[%s7720_s2 + $0x88] ss:$4 sm:$0xff] }
  0x30   :  { %5622 = vmatmul.mubr.msk.f32.gmra.mrb[8].mxu0 %vm145_vm1, %v4963_v23  ;;  %v5119_v23 = vld [vmem:[%s7720_s2 + $0x5] ss:$4 sm:$0xff] }
  0x31   :  { %5624 = vmatprep.mubr.msk.f32.mxu0 %vm145_vm1, %v4964_v24  ;;  %v5120_v24 = vld [vmem:[%s7720_s2 + $0x25] ss:$4 sm:$0xff] }
  0x34   :  { %5625 = vmatmul.mubr.msk.f32.gmra.mrb[10].mxu0 %vm145_vm1, %v4965_v25  ;;  %v5121_v25 = vld [vmem:[%s7720_s2 + $0x45] ss:$4 sm:$0xff] }
  0x35   :  { %5627 = vmatprep.mubr.msk.f32.mxu0 %vm145_vm1, %v4966_v26  ;;  %v1796_v26 = vld [vmem:[%s7719_s5 + $0x1c] sm:$0xf] }
  0x38   :  { %5628 = vmatmul.mubr.msk.f32.gmra.mrb[12].mxu0 %vm145_vm1, %v4967_v27  ;;  %v5122_v27 = vld [vmem:[%s7720_s2 + $0x65] ss:$4 sm:$0xff] }
  0x39   :  { %5630 = vmatprep.mubr.msk.f32.mxu0 %vm145_vm1, %v4968_v28  ;;  %v5123_v28 = vld [vmem:[%s7720_s2 + $0x85] ss:$4 sm:$0xff] }
  0x3c   :  { %5631 = vmatmul.mubr.msk.f32.gmra.mrb[14].mxu0 %vm145_vm1, %v4969_v29  ;;  %v5124_v29 = vld [vmem:[%s7720_s2 + $0xa5] ss:$4 sm:$0xff] }
  0x3d   :  { %5635 = vmatprep.mubr.msk.f32.mxu0 %vm145_vm1, %v5020_v30  ;;  %v5125_v30 = vld [vmem:[%s7720_s2 + $0xc5] ss:$4 sm:$0xff] }
  0x40   :  { %5636 = vmatmul.mubr.msk.f32.vlgmr.msra.gmra.mrb[0].mxu0 %vm145_vm1, %v5021_v31  ;;  %v5126_v31 = vld [vmem:[%s7720_s2 + $0xe5] ss:$4 sm:$0xff] }
  0x41   :  { %5638 = vmatprep.mubr.msk.f32.mxu0 %vm145_vm1, %v5022_v32  ;;  %5660 = vmatpush3.msk.msra.mxu0 %vm194_vm0, %v816_v16  ;;  %v4982_v16 = vld [vmem:[%s7720_s2 + $0x181] ss:$4 sm:$0xff] }
  0x42   :  { %5685 = vmatprep.subr.msk.mxu0 %vm194_vm0, %v1061_v33  ;;  %5601 = vmatprep.mubr.msk.f32.mxu1 %vm145_vm1, %v4982_v16  ;;  %v5127_v32 = vld [vmem:[%s7720_s2 + $0x105] ss:$4 sm:$0xff]  ;;  %v5225_v16 = vld [vmem:[%s7720_s2 + $0xe8] ss:$4 sm:$0xff] }
  0x43   :  { %5602 = vmatmul.mubr.msk.f32.gmra.mrb[2].mxu1 %vm145_vm1, %v4983_v17  ;;  %v5226_v17 = vld [vmem:[%s7720_s2 + $0x108] ss:$4 sm:$0xff] }
  0x44   :  { %5639 = vmatmul.mubr.msk.f32.gmra.mrb[2].mxu0 %vm145_vm1, %v5023_v34  ;;  %5604 = vmatprep.mubr.msk.f32.mxu1 %vm145_vm1, %v4984_v20  ;;  %v5129_v34 = vld [vmem:[%s7720_s2 + $0x145] ss:$4 sm:$0xff]  ;;  %v5229_v20 = vld [vmem:[%s7720_s2 + $0x168] ss:$4 sm:$0xff] }
  0x45   :  { %5641 = vmatprep.mubr.msk.f32.mxu0 %vm145_vm1, %v5024_v35  ;;  %v5130_v35 = vld [vmem:[%s7720_s2 + $0x165] ss:$4 sm:$0xff] }
  0x47   :  { %5605 = vmatmul.mubr.msk.f32.gmra.mrb[4].mxu1 %vm145_vm1, %v4985_v21  ;;  %v5230_v21 = vld [vmem:[%s7720_s2 + $0x188] ss:$4 sm:$0xff] }
  0x48   :  { %5642 = vmatmul.mubr.msk.f32.gmra.mrb[4].mxu0 %vm145_vm1, %v5025_v36  ;;  %v5131_v36 = vld [vmem:[%s7720_s2 + $0x185] ss:$4 sm:$0xff] }
  0x49   :  { %5644 = vmatprep.mubr.msk.f32.mxu0 %vm145_vm1, %v5026_v37  ;;  %v5132_v37 = vld [vmem:[%s7720_s2 + $0x1a5] ss:$4 sm:$0xff] }
  0x4c   :  { %5645 = vmatmul.mubr.msk.f32.gmra.mrb[6].mxu0 %vm145_vm1, %v5027_v38  ;;  %v5133_v38 = vld [vmem:[%s7720_s2 + $0x1c5] ss:$4 sm:$0xff] }
  0x4d   :  { %5647 = vmatprep.mubr.msk.f32.mxu0 %vm145_vm1, %v5028_v39  ;;  %v5134_v39 = vld [vmem:[%s7720_s2 + $0x1e5] ss:$4 sm:$0x1f] }
  0x50   :  { %5648 = vmatmul.mubr.msk.f32.gmra.mrb[8].mxu0 %vm145_vm1, %v5029_v40  ;;  %v5152_v40 = vld [vmem:[%s7720_s2 + $0x6] ss:$4 sm:$0xff] }
  0x51   :  { %5650 = vmatprep.mubr.msk.f32.mxu0 %vm145_vm1, %v5030_v41  ;;  %v5153_v41 = vld [vmem:[%s7720_s2 + $0x26] ss:$4 sm:$0xff] }
  0x54   :  { %5651 = vmatmul.mubr.msk.f32.gmra.mrb[10].mxu0 %vm145_vm1, %v5031_v42  ;;  %v5154_v42 = vld [vmem:[%s7720_s2 + $0x46] ss:$4 sm:$0xff] }
  0x55   :  { %5653 = vmatprep.mubr.msk.f32.mxu0 %vm145_vm1, %v5032_v43  ;;  %v2041_v43 = vld [vmem:[%s7719_s5 + $0x20] sm:$0xf]  ;;  %s7724_s5 = sld [smem:[#allocation9_spill]] }
  0x58   :  { %5654 = vmatmul.mubr.msk.f32.gmra.mrb[12].mxu0 %vm145_vm1, %v5033_v44  ;;  %v5155_v44 = vld [vmem:[%s7720_s2 + $0x66] ss:$4 sm:$0xff] }
  0x59   :  { %5656 = vmatprep.mubr.msk.f32.mxu0 %vm145_vm1, %v5034_v45  ;;  %v5156_v45 = vld [vmem:[%s7720_s2 + $0x86] ss:$4 sm:$0xff] }
  0x5c   :  { %5657 = vmatmul.mubr.msk.f32.gmra.mrb[14].mxu0 %vm145_vm1, %v5035_v46  ;;  %v5157_v46 = vld [vmem:[%s7720_s2 + $0xa6] ss:$4 sm:$0xff] }
  0x5d   :  { %5661 = vmatprep.mubr.msk.f32.mxu0 %vm145_vm1, %v5053_v47  ;;  %v5158_v47 = vld [vmem:[%s7720_s2 + $0xc6] ss:$4 sm:$0xff] }
  0x60   :  { %5662 = vmatmul.mubr.msk.f32.vlgmr.msra.gmra.mrb[0].mxu0 %vm145_vm1, %v5054_v48  ;;  %v5159_v48 = vld [vmem:[%s7720_s2 + $0xe6] ss:$4 sm:$0xff] }
  0x61   :  { %5664 = vmatprep.mubr.msk.f32.mxu0 %vm145_vm1, %v5055_v49  ;;  %5686 = vmatpush3.msk.msra.mxu0 %vm194_vm0, %v1061_v33  ;;  %v5128_v33 = vld [vmem:[%s7720_s2 + $0x125] ss:$4 sm:$0xff]  ;;  %v5160_v49 = vld [vmem:[%s7720_s2 + $0x106] ss:$4 sm:$0xff] }
  0x62   :  { %5711 = vmatprep.subr.msk.mxu0 %vm194_vm0, %v1306_v50 }
  0x64   :  { %5665 = vmatmul.mubr.msk.f32.gmra.mrb[2].mxu0 %vm145_vm1, %v5056_v51  ;;  %v5162_v51 = vld [vmem:[%s7720_s2 + $0x146] ss:$4 sm:$0xff] }
  0x65   :  { %5667 = vmatprep.mubr.msk.f32.mxu0 %vm145_vm1, %v5057_v52  ;;  %v5163_v52 = vld [vmem:[%s7720_s2 + $0x166] ss:$4 sm:$0xff] }
  0x68   :  { %5668 = vmatmul.mubr.msk.f32.gmra.mrb[4].mxu0 %vm145_vm1, %v5058_v53  ;;  %v5164_v53 = vld [vmem:[%s7720_s2 + $0x186] ss:$4 sm:$0xff] }
  0x69   :  { %5670 = vmatprep.mubr.msk.f32.mxu0 %vm145_vm1, %v5059_v54  ;;  %v5165_v54 = vld [vmem:[%s7720_s2 + $0x1a6] ss:$4 sm:$0xff] }
  0x6c   :  { %5671 = vmatmul.mubr.msk.f32.gmra.mrb[6].mxu0 %vm145_vm1, %v5060_v55  ;;  %v5166_v55 = vld [vmem:[%s7720_s2 + $0x1c6] ss:$4 sm:$0xff] }
  0x6d   :  { %5673 = vmatprep.mubr.msk.f32.mxu0 %vm145_vm1, %v5061_v56  ;;  %v5167_v56 = vld [vmem:[%s7720_s2 + $0x1e6] ss:$4 sm:$0x1f] }
  0x70   :  { %5674 = vmatmul.mubr.msk.f32.gmra.mrb[8].mxu0 %vm145_vm1, %v5062_v57  ;;  %v5185_v57 = vld [vmem:[%s7720_s2 + $0x7] ss:$4 sm:$0xff] }
  0x71   :  { %5676 = vmatprep.mubr.msk.f32.mxu0 %vm145_vm1, %v5063_v58  ;;  %v5186_v58 = vld [vmem:[%s7720_s2 + $0x27] ss:$4 sm:$0xff] }
  0x74   :  { %5677 = vmatmul.mubr.msk.f32.gmra.mrb[10].mxu0 %vm145_vm1, %v5064_v59  ;;  %v5187_v59 = vld [vmem:[%s7720_s2 + $0x47] ss:$4 sm:$0xff] }
  0x75   :  { %5679 = vmatprep.mubr.msk.f32.mxu0 %vm145_vm1, %v5065_v60  ;;  %v5188_v60 = vld [vmem:[%s7720_s2 + $0x67] ss:$4 sm:$0xff] }
  0x78   :  { %5680 = vmatmul.mubr.msk.f32.gmra.mrb[12].mxu0 %vm145_vm1, %v5066_v61  ;;  %v5189_v61 = vld [vmem:[%s7720_s2 + $0x87] ss:$4 sm:$0xff] }
  0x79   :  { %5682 = vmatprep.mubr.msk.f32.mxu0 %vm145_vm1, %v5067_v62  ;;  %v5190_v62 = vld [vmem:[%s7720_s2 + $0xa7] ss:$4 sm:$0xff] }
  0x7c   :  { %5683 = vmatmul.mubr.msk.f32.gmra.mrb[14].mxu0 %vm145_vm1, %v5068_v63  ;;  %v5191_v63 = vld [vmem:[%s7720_s2 + $0xc7] ss:$4 sm:$0xff] }
  0x7d   :  { %5687 = vmatprep.mubr.msk.f32.mxu0 %vm145_vm1, %v5086_v0  ;;  %v5192_v0 = vld [vmem:[%s7720_s2 + $0xe7] ss:$4 sm:$0xff] }
  0x80   :  { %5688 = vmatmul.mubr.msk.f32.vlgmr.msra.gmra.mrb[0].mxu0 %vm145_vm1, %v5087_v1  ;;  %v5193_v1 = vld [vmem:[%s7720_s2 + $0x107] ss:$4 sm:$0xff] }
  0x81   :  { %5690 = vmatprep.mubr.msk.f32.mxu0 %vm145_vm1, %v5088_v2  ;;  %5712 = vmatpush3.msk.msra.mxu0 %vm194_vm0, %v1306_v50  ;;  %v5161_v50 = vld [vmem:[%s7720_s2 + $0x126] ss:$4 sm:$0xff]  ;;  %v5194_v2 = vld [vmem:[%s7720_s2 + $0x127] ss:$4 sm:$0xff] }
  0x82   :  { %5737 = vmatprep.subr.msk.mxu0 %vm194_vm0, %v1551_v3 }
  0x84   :  { %5691 = vmatmul.mubr.msk.f32.gmra.mrb[2].mxu0 %vm145_vm1, %v5089_v4  ;;  %v5196_v4 = vld [vmem:[%s7720_s2 + $0x167] ss:$4 sm:$0xff] }
  0x85   :  { %5693 = vmatprep.mubr.msk.f32.mxu0 %vm145_vm1, %v5090_v5  ;;  %v5197_v5 = vld [vmem:[%s7720_s2 + $0x187] ss:$4 sm:$0xff] }
  0x88   :  { %5694 = vmatmul.mubr.msk.f32.gmra.mrb[4].mxu0 %vm145_vm1, %v5091_v6  ;;  %v5198_v6 = vld [vmem:[%s7720_s2 + $0x1a7] ss:$4 sm:$0xff] }
  0x89   :  { %5696 = vmatprep.mubr.msk.f32.mxu0 %vm145_vm1, %v5092_v7  ;;  %v5199_v7 = vld [vmem:[%s7720_s2 + $0x1c7] ss:$4 sm:$0xff] }
  0x8c   :  { %5697 = vmatmul.mubr.msk.f32.gmra.mrb[6].mxu0 %vm145_vm1, %v5093_v8  ;;  %v5200_v8 = vld [vmem:[%s7720_s2 + $0x1e7] ss:$4 sm:$0x1f] }
  0x8d   :  { %5699 = vmatprep.mubr.msk.f32.mxu0 %vm145_vm1, %v5094_v9  ;;  %v5218_v9 = vld [vmem:[%s7720_s2 + $0x8] ss:$4 sm:$0xff] }
  0x90   :  { %5700 = vmatmul.mubr.msk.f32.gmra.mrb[8].mxu0 %vm145_vm1, %v5095_v10  ;;  %v5219_v10 = vld [vmem:[%s7720_s2 + $0x28] ss:$4 sm:$0xff] }
  0x91   :  { %5702 = vmatprep.mubr.msk.f32.mxu0 %vm145_vm1, %v5096_v11  ;;  %v5220_v11 = vld [vmem:[%s7720_s2 + $0x48] ss:$4 sm:$0xff] }
  0x94   :  { %5703 = vmatmul.mubr.msk.f32.gmra.mrb[10].mxu0 %vm145_vm1, %v5097_v14  ;;  %v5223_v14 = vld [vmem:[%s7720_s2 + $0xa8] ss:$4 sm:$0xff] }
  0x95   :  { %5705 = vmatprep.mubr.msk.f32.mxu0 %vm145_vm1, %v5098_v15  ;;  %v5224_v15 = vld [vmem:[%s7720_s2 + $0xc8] ss:$4 sm:$0xff] }
  0x98   :  { %5706 = vmatmul.mubr.msk.f32.gmra.mrb[12].mxu0 %vm145_vm1, %v5099_v18  ;;  %v5227_v18 = vld [vmem:[%s7720_s2 + $0x128] ss:$4 sm:$0xff] }
  0x99   :  { %5708 = vmatprep.mubr.msk.f32.mxu0 %vm145_vm1, %v5100_v19  ;;  %v5228_v19 = vld [vmem:[%s7720_s2 + $0x148] ss:$4 sm:$0xff] }
  0x9c   :  { %5709 = vmatmul.mubr.msk.f32.gmra.mrb[14].mxu0 %vm145_vm1, %v5101_v22  ;;  %v5231_v22 = vld [vmem:[%s7720_s2 + $0x1a8] ss:$4 sm:$0xff] }
  0x9d   :  { %5713 = vmatprep.mubr.msk.f32.mxu0 %vm145_vm1, %v5119_v23  ;;  %v5232_v23 = vld [vmem:[%s7720_s2 + $0x1c8] ss:$4 sm:$0xff] }
  0xa0   :  { %5714 = vmatmul.mubr.msk.f32.vlgmr.msra.gmra.mrb[0].mxu0 %vm145_vm1, %v5120_v24  ;;  %v5233_v24 = vld [vmem:[%s7720_s2 + $0x1e8] ss:$4 sm:$0x1f] }
  0xa1   :  { %5716 = vmatprep.mubr.msk.f32.mxu0 %vm145_vm1, %v5121_v25  ;;  %5738 = vmatpush3.msk.msra.mxu0 %vm194_vm0, %v1551_v3  ;;  %v5195_v3 = vld [vmem:[%s7720_s2 + $0x147] ss:$4 sm:$0xff]  ;;  %s7721_s2 = sld [smem:[#allocation6_spill]] }
  0xa2   :  { %5763 = vmatprep.subr.msk.mxu0 %vm194_vm0, %v1796_v26 }
  0xa4   :  { %5717 = vmatmul.mubr.msk.f32.gmra.mrb[2].mxu0 %vm145_vm1, %v5122_v27 }
  0xa5   :  { %5719 = vmatprep.mubr.msk.f32.mxu0 %vm145_vm1, %v5123_v28 }
  0xa8   :  { %5720 = vmatmul.mubr.msk.f32.gmra.mrb[4].mxu0 %vm145_vm1, %v5124_v29 }
  0xa9   :  { %5722 = vmatprep.mubr.msk.f32.mxu0 %vm145_vm1, %v5125_v30 }
  0xac   :  { %5723 = vmatmul.mubr.msk.f32.gmra.mrb[6].mxu0 %vm145_vm1, %v5126_v31  ;;  %v6283_v31 = vmov 0.0|0.0  }
  0xad   :  { %5725 = vmatprep.mubr.msk.f32.mxu0 %vm145_vm1, %v5127_v32  ;;  %6081 = vmatprep.subr.bf16.mxu1 %v6283_v31  ;;  %v2419_v32 = vld [vmem:[%s7721_s2] sm:$0xff] }
  0xb0   :  { %5726 = vmatmul.mubr.msk.f32.gmra.mrb[8].mxu0 %vm145_vm1, %v5128_v33  ;;  %v2420_v33 = vld [vmem:[%s7721_s2 + $0x8] sm:$0xff] }
  0xb1   :  { %5728 = vmatprep.mubr.msk.f32.mxu0 %vm145_vm1, %v5129_v34  ;;  %v6285_v34 = vmov 0.0  }
  0xb2   :  { %5819 = vmatprep.mubr.msk.f32.mxu1 %vm6284_vm2, %v6285_v34 }
  0xb4   :  { %5729 = vmatmul.mubr.msk.f32.gmra.mrb[10].mxu0 %vm145_vm1, %v5130_v35  ;;  %v6082_v35 = vpack.c.bf16 %v2420_v33, %v2419_v32 }
  0xb5   :  { %5731 = vmatprep.mubr.msk.f32.mxu0 %vm145_vm1, %v5131_v36  ;;  %v7069_v36 = vld [vmem:[%s7722_s11] ss:$0 sm:$0xff]  ;;  %s7728_s11 = sld [smem:[#allocation13_spill]] }
  0xb6   :  { %6083 = vmatpush3.bf16.msra.mxu1 %v6082_v35 }
  0xb7   :  { %5822 = vmatprep.subr.mxu1 %v6285_v34 }
  0xb8   :  { %5732 = vmatmul.mubr.msk.f32.gmra.mrb[12].mxu0 %vm145_vm1, %v5132_v37 }
  0xb9   :  { %5734 = vmatprep.mubr.msk.f32.mxu0 %vm145_vm1, %v5133_v38 }
  0xbc   :  { %5735 = vmatmul.mubr.msk.f32.gmra.mrb[14].mxu0 %vm145_vm1, %v5134_v39 }
  0xbd   :  { %5739 = vmatprep.mubr.msk.f32.mxu0 %vm145_vm1, %v5152_v40 }
  0xc0   :  { %5740 = vmatmul.mubr.msk.f32.vlgmr.msra.gmra.mrb[0].mxu0 %vm145_vm1, %v5153_v41 }
  0xc1   :  { %5742 = vmatprep.mubr.msk.f32.mxu0 %vm145_vm1, %v5154_v42  ;;  %5764 = vmatpush3.msk.msra.mxu0 %vm194_vm0, %v1796_v26 }
  0xc2   :  { %5789 = vmatprep.subr.msk.mxu0 %vm194_vm0, %v2041_v43 }
  0xc4   :  { %5743 = vmatmul.mubr.msk.f32.gmra.mrb[2].mxu0 %vm145_vm1, %v5155_v44 }
  0xc5   :  { %5745 = vmatprep.mubr.msk.f32.mxu0 %vm145_vm1, %v5156_v45 }
  0xc8   :  { %5746 = vmatmul.mubr.msk.f32.gmra.mrb[4].mxu0 %vm145_vm1, %v5157_v46 }
  0xc9   :  { %5748 = vmatprep.mubr.msk.f32.mxu0 %vm145_vm1, %v5158_v47 }
  0xcc   :  { %5749 = vmatmul.mubr.msk.f32.gmra.mrb[6].mxu0 %vm145_vm1, %v5159_v48 }
  0xcd   :  { %5751 = vmatprep.mubr.msk.f32.mxu0 %vm145_vm1, %v5160_v49 }
  0xd0   :  { %5752 = vmatmul.mubr.msk.f32.gmra.mrb[8].mxu0 %vm145_vm1, %v5161_v50 }
  0xd1   :  { %5754 = vmatprep.mubr.msk.f32.mxu0 %vm145_vm1, %v5162_v51 }
  0xd4   :  { %5755 = vmatmul.mubr.msk.f32.gmra.mrb[10].mxu0 %vm145_vm1, %v5163_v52 }
  0xd5   :  { %5757 = vmatprep.mubr.msk.f32.mxu0 %vm145_vm1, %v5164_v53 }
  0xd8   :  { %5758 = vmatmul.mubr.msk.f32.gmra.mrb[12].mxu0 %vm145_vm1, %v5165_v54 }
  0xd9   :  { %5760 = vmatprep.mubr.msk.f32.mxu0 %vm145_vm1, %v5166_v55 }
  0xdc   :  { %5761 = vmatmul.mubr.msk.f32.gmra.mrb[14].mxu0 %vm145_vm1, %v5167_v56 }
  0xdd   :  { %5765 = vmatprep.mubr.msk.f32.mxu0 %vm145_vm1, %v5185_v57 }
  0xe0   :  { %5766 = vmatmul.mubr.msk.f32.vlgmr.msra.gmra.mrb[0].mxu0 %vm145_vm1, %v5186_v58 }
  0xe1   :  { %5768 = vmatprep.mubr.msk.f32.mxu0 %vm145_vm1, %v5187_v59  ;;  %5790 = vmatpush3.msk.msra.mxu0 %vm194_vm0, %v2041_v43 }
  0xe4   :  { %5769 = vmatmul.mubr.msk.f32.gmra.mrb[2].mxu0 %vm145_vm1, %v5188_v60 }
  0xe5   :  { %5771 = vmatprep.mubr.msk.f32.mxu0 %vm145_vm1, %v5189_v61 }
  0xe8   :  { %5772 = vmatmul.mubr.msk.f32.gmra.mrb[4].mxu0 %vm145_vm1, %v5190_v62 }
  0xe9   :  { %5774 = vmatprep.mubr.msk.f32.mxu0 %vm145_vm1, %v5191_v63 }
  0xec   :  { %5775 = vmatmul.mubr.msk.f32.gmra.mrb[6].mxu0 %vm145_vm1, %v5192_v0 }
  0xed   :  { %5777 = vmatprep.mubr.msk.f32.mxu0 %vm145_vm1, %v5193_v1 }
  0xf0   :  { %5778 = vmatmul.mubr.msk.f32.gmra.mrb[8].mxu0 %vm145_vm1, %v5194_v2 }
  0xf1   :  { %5780 = vmatprep.mubr.msk.f32.mxu0 %vm145_vm1, %v5195_v3  ;;  %v7044_v25 = vpop.f32.mrb[0].mxu1 }
  0xf2   :  { %v7046_v26 = vpop.f32.mrb[1].mxu1 }
  0xf4   :  { %5781 = vmatmul.mubr.msk.f32.gmra.mrb[10].mxu0 %vm145_vm1, %v5196_v4 }
  0xf5   :  { %5783 = vmatprep.mubr.msk.f32.mxu0 %vm145_vm1, %v5197_v5 }
  0xf8   :  { %5784 = vmatmul.mubr.msk.f32.gmra.mrb[12].mxu0 %vm145_vm1, %v5198_v6 }
  0xf9   :  { %5786 = vmatprep.mubr.msk.f32.mxu0 %vm145_vm1, %v5199_v7 }
  0xfc   :  { %5787 = vmatmul.mubr.msk.f32.gmra.mrb[14].mxu0 %vm145_vm1, %v5200_v8 }
  0xfd   :  { %5791 = vmatprep.mubr.msk.f32.mxu0 %vm145_vm1, %v5218_v9 }
 0x100   :  { %5792 = vmatmul.mubr.msk.f32.vlgmr.msra.gmra.mrb[0].mxu0 %vm145_vm1, %v5219_v10 }
 0x101   :  { %5794 = vmatprep.mubr.msk.f32.mxu0 %vm145_vm1, %v5220_v11 }
 0x104   :  { %5795 = vmatmul.mubr.msk.f32.gmra.mrb[2].mxu0 %vm145_vm1, %v5221_v12 }
 0x105   :  { %5797 = vmatprep.mubr.msk.f32.mxu0 %vm145_vm1, %v5222_v13 }
 0x108   :  { %5798 = vmatmul.mubr.msk.f32.gmra.mrb[4].mxu0 %vm145_vm1, %v5223_v14 }
 0x109   :  { %5800 = vmatprep.mubr.msk.f32.mxu0 %vm145_vm1, %v5224_v15 }
 0x10c   :  { %5801 = vmatmul.mubr.msk.f32.gmra.mrb[6].mxu0 %vm145_vm1, %v5225_v16 }
 0x10d   :  { %5803 = vmatprep.mubr.msk.f32.mxu0 %vm145_vm1, %v5226_v17 }
 0x110   :  { %5804 = vmatmul.mubr.msk.f32.gmra.mrb[8].mxu0 %vm145_vm1, %v5227_v18 }
 0x111   :  { %5806 = vmatprep.mubr.msk.f32.mxu0 %vm145_vm1, %v5228_v19 }
 0x114   :  { %5807 = vmatmul.mubr.msk.f32.gmra.mrb[10].mxu0 %vm145_vm1, %v5229_v20 }
 0x115   :  { %5809 = vmatprep.mubr.msk.f32.mxu0 %vm145_vm1, %v5230_v21 }
 0x116   :  { %v7048_v27 = vpop.f32.mrb[2].mxu1 }
 0x117   :  { %v7050_v28 = vpop.f32.mrb[3].mxu1 }
 0x118   :  { %5810 = vmatmul.mubr.msk.f32.gmra.mrb[12].mxu0 %vm145_vm1, %v5231_v22 }
 0x119   :  { %5812 = vmatprep.mubr.msk.f32.mxu0 %vm145_vm1, %v5232_v23 }
 0x11a   :  { %v7052_v29 = vpop.f32.mrb[4].mxu1 }
 0x11b   :  { %v7054_v30 = vpop.f32.mrb[5].mxu1 }
 0x11c   :  { %5813 = vmatmul.mubr.msk.f32.gmra.mrb[14].mxu0 %vm145_vm1, %v5233_v24 }
 0x1d3   :  { %v5793_v37 = vpop.f32.mrb[0].mxu0 }
 0x1d4   :  { %v2262_v38 = vadd.f32 %v5793_v37, %v7069_v36  ;;  %v2159_v39 = vpop.f32.mrb[1].mxu0 }
 0x1d5   :  { %v2261_v40 = vadd.f32 %v7069_v36, %v2159_v39 }
 0x1d6   :  { %vm2278_vm3 = vcmp.gt.f32.partialorder %v2262_v38, 0.0  ;;  %v2294_v41 = vmul.f32 0.01, %v2262_v38 }
 0x1d7   :  { %vm2277_vm5 = vcmp.gt.f32.partialorder %v2261_v40, 0.0  ;;  %v2293_v42 = vmul.f32 0.01, %v2261_v40  ;;  %v5796_v43 = vpop.f32.mrb[2].mxu0 }
 0x1d8   :  { %v7073_v44 = vsel %vm2278_vm3, %v2262_v38, %v2294_v41  ;;  %v2264_v45 = vadd.f32 %v5796_v43, %v7069_v36  ;;  %v2169_v46 = vpop.f32.mrb[3].mxu0 }
 0x1d9   :  { %v2327_v47 = vsel %vm2325_vm4, %v7073_v44, 0.0  ;;  %v2365_v48 = vmul.f32 %v7073_v44, %v7073_v44  ;;  %v7080_v49 = vsel %vm2277_vm5, %v2261_v40, %v2293_v42  ;;  %v2263_v50 = vadd.f32 %v7069_v36, %v2169_v46 }
 0x1da   :  { %v2326_v51 = vsel %vm2325_vm4, %v7080_v49, 0.0  ;;  %v2364_v52 = vmul.f32 %v7080_v49, %v7080_v49  ;;  %vm2280_vm6 = vcmp.gt.f32.partialorder %v2264_v45, 0.0  ;;  %v2296_v53 = vmul.f32 0.01, %v2264_v45 }
 0x1db   :  { %vm2279_vm7 = vcmp.gt.f32.partialorder %v2263_v50, 0.0  ;;  %v2295_v54 = vmul.f32 0.01, %v2263_v50  ;;  %v5799_v55 = vpop.f32.mrb[4].mxu0  ;;  %v2381_v56 = vsel %vm2325_vm4, %v2365_v48, 0.0  ;;  %v2328_v61 = vadd.f32 %v2327_v47, %v2326_v51 }
 0x1dc   :  { %v2380_v57 = vsel %vm2325_vm4, %v2364_v52, 0.0  ;;  %v7089_v58 = vsel %vm2280_vm6, %v2264_v45, %v2296_v53  ;;  %v2266_v59 = vadd.f32 %v5799_v55, %v7069_v36  ;;  %v2179_v60 = vpop.f32.mrb[5].mxu0 }
 0x1dd   :  { %v7092_v62 = vsel %vm2279_vm7, %v2263_v50, %v2295_v54  ;;  %v2382_v2 = vadd.f32 %v2381_v56, %v2380_v57  ;;  %v2367_v3 = vmul.f32 %v7089_v58, %v7089_v58  ;;  %v2265_v5 = vadd.f32 %v7069_v36, %v2179_v60 }
 0x1de   :  { %v2329_v63 = vsel %vm2325_vm4, %v7092_v62, 0.0  ;;  %v2366_v0 = vmul.f32 %v7092_v62, %v7092_v62  ;;  %vm2282_vm8 = vcmp.gt.f32.partialorder %v2266_v59, 0.0  ;;  %v2298_v1 = vmul.f32 0.01, %v2266_v59 }
 0x1df   :  { %v2330_v4 = vadd.f32 %v2329_v63, %v2328_v61  ;;  %v5802_v6 = vpop.f32.mrb[6].mxu0  ;;  %v2331_v11 = vsel %vm2325_vm4, %v7089_v58, 0.0  ;;  %vm2281_vm9 = vcmp.gt.f32.partialorder %v2265_v5, 0.0  ;;  %v2297_v13 = vmul.f32 0.01, %v2265_v5 }
 0x1e0   :  { %v2383_v7 = vsel %vm2325_vm4, %v2366_v0, 0.0  ;;  %v7102_v8 = vsel %vm2282_vm8, %v2266_v59, %v2298_v1  ;;  %v2268_v9 = vadd.f32 %v5802_v6, %v7069_v36  ;;  %v2189_v10 = vpop.f32.mrb[7].mxu0  ;;  %v2385_v16 = vsel %vm2325_vm4, %v2367_v3, 0.0 }
 0x1e1   :  { %v2384_v12 = vadd.f32 %v2383_v7, %v2382_v2  ;;  %v2332_v14 = vadd.f32 %v2331_v11, %v2330_v4  ;;  %v2369_v17 = vmul.f32 %v7102_v8, %v7102_v8  ;;  %v2267_v18 = vadd.f32 %v7069_v36, %v2189_v10 }
 0x1e2   :  { %vm2284_vm10 = vcmp.gt.f32.partialorder %v2268_v9, 0.0  ;;  %v2300_v15 = vmul.f32 0.01, %v2268_v9  ;;  %v7111_v20 = vsel %vm2281_vm9, %v2265_v5, %v2297_v13  ;;  %v2335_v32 = vsel %vm2325_vm4, %v7102_v8, 0.0 }
 0x1e3   :  { %v5805_v19 = vpop.f32.mrb[8].mxu0  ;;  %v2386_v21 = vadd.f32 %v2385_v16, %v2384_v12  ;;  %v2333_v33 = vsel %vm2325_vm4, %v7111_v20, 0.0  ;;  %v2368_v35 = vmul.f32 %v7111_v20, %v7111_v20  ;;  %vm2283_vm11 = vcmp.gt.f32.partialorder %v2267_v18, 0.0 }
 0x1e4   :  { %v7113_v22 = vsel %vm2284_vm10, %v2268_v9, %v2300_v15  ;;  %v2270_v23 = vadd.f32 %v5805_v19, %v7069_v36  ;;  %v2199_v24 = vpop.f32.mrb[9].mxu0  ;;  %v2334_v38 = vadd.f32 %v2333_v33, %v2332_v14  ;;  %v2299_v39 = vmul.f32 0.01, %v2267_v18 }
 0x1e5   :  { %v2371_v37 = vmul.f32 %v7113_v22, %v7113_v22  ;;  %v2389_v40 = vsel %vm2325_vm4, %v2369_v17, 0.0  ;;  %v2387_v41 = vsel %vm2325_vm4, %v2368_v35, 0.0  ;;  %v2269_v43 = vadd.f32 %v7069_v36, %v2199_v24 }
 0x1e6   :  { %vm2286_vm12 = vcmp.gt.f32.partialorder %v2270_v23, 0.0  ;;  %v2302_v42 = vmul.f32 0.01, %v2270_v23  ;;  %v2388_v46 = vadd.f32 %v2387_v41, %v2386_v21  ;;  %v7127_v47 = vsel %vm2283_vm11, %v2267_v18, %v2299_v39 }
 0x1e7   :  { %v5808_v45 = vpop.f32.mrb[10].mxu0  ;;  %v2336_v48 = vadd.f32 %v2335_v32, %v2334_v38  ;;  %v2339_v52 = vsel %vm2325_vm4, %v7113_v22, 0.0  ;;  %v2337_v53 = vsel %vm2325_vm4, %v7127_v47, 0.0  ;;  %v2370_v54 = vmul.f32 %v7127_v47, %v7127_v47 }
 0x1e8   :  { %v6121_v50 = vadd.f32 %v5808_v45, %v7044_v25  ;;  %v2209_v51 = vpop.f32.mrb[11].mxu0  ;;  %v7136_v55 = vsel %vm2286_vm12, %v2270_v23, %v2302_v42  ;;  %v2393_v56 = vsel %vm2325_vm4, %v2371_v37, 0.0  ;;  %v2390_v59 = vadd.f32 %v2389_v40, %v2388_v46 }
 0x1e9   :  { %v2338_v57 = vadd.f32 %v2337_v53, %v2336_v48  ;;  %vm2285_vm13 = vcmp.gt.f32.partialorder %v2269_v43, 0.0  ;;  %v2391_v60 = vsel %vm2325_vm4, %v2370_v54, 0.0  ;;  %v2301_v25 = vmul.f32 0.01, %v2269_v43 }
 0x1ea   :  { %v2272_v61 = vadd.f32 %v6121_v50, %v7069_v36  ;;  %v6122_v63 = vadd.f32 %v2209_v51, %v7046_v26  ;;  %v2392_v1 = vadd.f32 %v2391_v60, %v2390_v59  ;;  %v2373_v2 = vmul.f32 %v7136_v55, %v7136_v55 }
 0x1eb   :  { %v5811_v0 = vpop.f32.mrb[12].mxu0  ;;  %v2340_v3 = vadd.f32 %v2339_v52, %v2338_v57  ;;  %v7145_v6 = vsel %vm2285_vm13, %v2269_v43, %v2301_v25  ;;  %v2343_v16 = vsel %vm2325_vm4, %v7136_v55, 0.0  ;;  %vm2355_vm8 = vcmask 126976  }
 0x1ec   :  { %v6123_v4 = vadd.f32 %v5811_v0, %v7048_v27  ;;  %v2219_v5 = vpop.f32.mrb[13].mxu0  ;;  %vm2288_vm14 = vcmp.gt.f32.partialorder %v2272_v61, 0.0  ;;  %v2304_v7 = vmul.f32 0.01, %v2272_v61  ;;  %v2271_v9 = vadd.f32 %v6122_v63, %v7069_v36 }
 0x1ed   :  { %v2341_v10 = vsel %vm2325_vm4, %v7145_v6, 0.0  ;;  %v2372_v26 = vmul.f32 %v7145_v6, %v7145_v6  ;;  %v2394_v11 = vadd.f32 %v2393_v56, %v2392_v1  ;;  %v2397_v17 = vsel %vm2325_vm4, %v2373_v2, 0.0 }
 0x1ee   :  { %v2274_v12 = vadd.f32 %v6123_v4, %v7069_v36  ;;  %v2342_v13 = vadd.f32 %v2341_v10, %v2340_v3  ;;  %v7153_v14 = vsel %vm2288_vm14, %v2272_v61, %v2304_v7  ;;  %vm2287_vm15 = vcmp.gt.f32.partialorder %v2271_v9, 0.0 }
 0x1ef   :  { %v2303_v27 = vmul.f32 0.01, %v2271_v9  ;;  %v5814_v15 = vpop.f32.mrb[14].mxu0  ;;  %v2395_v18 = vsel %vm2325_vm4, %v2372_v26, 0.0  ;;  %v2375_v24 = vmul.f32 %v7153_v14, %v7153_v14  ;;  %v6124_v38 = vadd.f32 %v2219_v5, %v7050_v28 }
 0x1f0   :  { %v2229_v19 = vpop.f32.mrb[15].mxu0  ;;  %v2344_v21 = vadd.f32 %v2343_v16, %v2342_v13  ;;  %v2396_v23 = vadd.f32 %v2395_v18, %v2394_v11  ;;  %v2306_v37 = vmul.f32 0.01, %v2274_v12  ;;  %vm2290_vm3 = vcmp.gt.f32.partialorder %v2274_v12, 0.0 }
 0x1f1   :  { %v7161_v32 = vsel %vm2287_vm15, %v2271_v9, %v2303_v27  ;;  %v6125_v41 = vadd.f32 %v5814_v15, %v7052_v29  ;;  %v2273_v43 = vadd.f32 %v6124_v38, %v7069_v36  ;;  %v2347_v45 = vsel %vm2325_vm4, %v7153_v14, 0.0 }
 0x1f2   :  { %v2345_v33 = vsel %vm2325_vm4, %v7161_v32, 0.0  ;;  %v2374_v35 = vmul.f32 %v7161_v32, %v7161_v32  ;;  %v2398_v39 = vadd.f32 %v2397_v17, %v2396_v23  ;;  %v6126_v50 = vadd.f32 %v2229_v19, %v7054_v30 }
 0x1f3   :  { %v2346_v40 = vadd.f32 %v2345_v33, %v2344_v21  ;;  %v2276_v48 = vadd.f32 %v6125_v41, %v7069_v36  ;;  %v7175_v51 = vsel %vm2290_vm3, %v2274_v12, %v2306_v37  ;;  %vm2289_vm5 = vcmp.gt.f32.partialorder %v2273_v43, 0.0 }
 0x1f4   :  { %v2399_v42 = vsel %vm2325_vm4, %v2374_v35, 0.0  ;;  %v2305_v28 = vmul.f32 0.01, %v2273_v43  ;;  %v2401_v53 = vsel %vm2325_vm4, %v2375_v24, 0.0  ;;  %v2275_v54 = vadd.f32 %v6126_v50, %v7069_v36 }
 0x1f5   :  { %v2400_v46 = vadd.f32 %v2399_v42, %v2398_v39  ;;  %v2348_v52 = vadd.f32 %v2347_v45, %v2346_v40  ;;  %vm2292_vm6 = vcmp.gt.f32.partialorder %v2276_v48, 0.0  ;;  %v2308_v29 = vmul.f32 0.01, %v2276_v48  ;;  %v2532_v42 = vld [vmem:[%s7723_s28] sm:$0xff] }
 0x1f6   :  { %v7179_v56 = vsel %vm2289_vm5, %v2273_v43, %v2305_v28  ;;  %v2377_v59 = vmul.f32 %v7175_v51, %v7175_v51  ;;  %vm2291_vm7 = vcmp.gt.f32.partialorder %v2275_v54, 0.0  ;;  %v2307_v63 = vmul.f32 0.01, %v2275_v54 }
 0x1f7   :  { %v2402_v57 = vadd.f32 %v2401_v53, %v2400_v46  ;;  %v2349_v30 = vsel %vm2325_vm4, %v7179_v56, 0.0  ;;  %v2376_v60 = vmul.f32 %v7179_v56, %v7179_v56  ;;  %v7187_v61 = vsel %vm2292_vm6, %v2276_v48, %v2308_v29 }
 0x1f8   :  { %v2350_v25 = vadd.f32 %v2349_v30, %v2348_v52  ;;  %v2351_v36 = vsel %vm2325_vm4, %v7175_v51, 0.0  ;;  %v7192_v2 = vsel %vm2291_vm7, %v2275_v54, %v2307_v63  ;;  %v2405_v4 = vsel %vm2325_vm4, %v2377_v59, 0.0 }
 0x1f9   :  { %v2403_v0 = vsel %vm2325_vm4, %v2376_v60, 0.0  ;;  %v2379_v5 = vmul.f32 %v7187_v61, %v7187_v61  ;;  %v2353_v7 = vsel %vm2325_vm4, %v7192_v2, 0.0  ;;  %v2378_v9 = vmul.f32 %v7192_v2, %v7192_v2 }
 0x1fa   :  { %v2404_v1 = vadd.f32 %v2403_v0, %v2402_v57  ;;  %v2352_v3 = vadd.f32 %v2351_v36, %v2350_v25  ;;  %v2356_v11 = vsel %vm2355_vm8, %v7187_v61, 0.0  ;;  %vm2417_vm9 = vcmask 1040384   ;;  %v2501_v0 = vld [vmem:[%s7724_s5] sm:$0x1] }
 0x1fb   :  { %v2407_v12 = vsel %vm2325_vm4, %v2378_v9, 0.0  ;;  %v2409_v15 = vsel %vm2355_vm8, %v2379_v5, 0.0  ;;  %v6286_v29 = vmov 1966171168   ;;  %v2508_v57 = vlaneseq }
 0x1fc   :  { %v2354_v10 = vadd.f32 %v2353_v7, %v2352_v3  ;;  %v2406_v26 = vadd.f32 %v2405_v4, %v2404_v1  ;;  %v2506_v54 = vunpack.c.l.s4 %v6286_v29  ;;  %v2522_v4 = vld [vmem:[%s7725_s29] sm:$0x1]  ;;  %vm2533_vm10 = vcmask 64512  }
 0x1fd   :  { %v2509_v30 = vshrl.u32 %v2508_v57, 7  ;;  %vm4291_vm5 = vcmask 25600   ;;  %vm4435_vm6 = vcmask 1041408   ;;  %vm4529_vm7 = vcmask 146432  }
 0x1fe   :  { %v2357_v13 = vadd.f32 %v2356_v11, %v2354_v10  ;;  %v2408_v27 = vadd.f32 %v2407_v12, %v2406_v26  ;;  %v2507_v59 = vunpack.c.0.s8 %v2506_v54  ;;  %v2684_v11 = vld [vmem:[%s7726_s7 + $0x10] sm:$0xff]  ;;  %v2685_v12 = vld [vmem:[%s7726_s7 + $0x18] sm:$0xff] }
 0x1ff   :  { %v7223_v7 = vsub.s32 0, %v2509_v30 }
 0x200   :  { %v2358_v16 = vrot.slane %v2357_v13, 4  ;;  %v2410_v17 = vadd.f32 %v2409_v15, %v2408_v27  ;;  %v7213_v60 = vsub.s32 %v2507_v59, %v2509_v30  ;;  %v7237_v27 = vsub.s32 1, %v2509_v30  ;;  %v2906_v59 = vld [vmem:[%s7726_s7 + $0x20] sm:$0xff]  ;;  %v2907_v30 = vld [vmem:[%s7726_s7 + $0x28] sm:$0xff] }
 0x202   :  { %v2359_v18 = vadd.f32 %v2358_v16, %v2357_v13  ;;  %v2411_v19 = vrot.slane %v2410_v17, 4  ;;  %v6085_v13 = vpack.c.bf16 %v2685_v12, %v2684_v11 }
 0x204   :  { %v2360_v21 = vrot.slane %v2359_v18, 2  ;;  %v2412_v23 = vadd.f32 %v2411_v19, %v2410_v17 }
 0x206   :  { %v2361_v24 = vadd.f32 %v2360_v21, %v2359_v18  ;;  %v2413_v33 = vrot.slane %v2412_v23, 2 }
 0x208   :  { %v2362_v35 = vrot.slane %v2361_v24, 1  ;;  %v2414_v37 = vadd.f32 %v2413_v33, %v2412_v23 }
 0x20a   :  { %v2415_v38 = vrot.slane %v2414_v37, 1  ;;  %v2363_v39 = vadd.f32 %v2362_v35, %v2361_v24 }
 0x20c   :  { %v2416_v40 = vadd.f32 %v2415_v38, %v2414_v37 }
 0x20e   :  { %v2418_v41 = vsel %vm2417_vm9, %v2363_v39, %v2416_v40 }
 0x20f   :  { %5820 = vmatmul.mubr.msk.f32.vlgmr.msra.gmra.mrb[6].mxu1 %vm2325_vm4, %v2418_v41 }
 0x210   :  { %5824 = vmatprep.mubr.msk.f32.mxu1 %vm6284_vm2, %v6285_v34  ;;  %5823 = vmatpush3.msra.mxu1 %v2532_v42 }
 0x211   :  { %6084 = vmatprep.subr.bf16.mxu1 %v6283_v31 }
 0x2e2   :  { %v2490_v43 = vpop.f32.mrb[6].mxu1 }
 0x2e3   :  { %v2494_v45 = vmul.f32 0.004, %v2490_v43  ;;  %v5821_v46 = vpop.f32.mrb[7].mxu1 }
 0x2e5   :  { %v2495_v48 = vmul.f32 %v2494_v45, %v2494_v45 }
 0x2e7   :  { %v2497_v50 = vrot.slane %v2495_v48, 7 }
 0x2e9   :  { %v2499_v28 = vsub.f32 %v2494_v45, %v2497_v50 }
 0x2eb   :  { %v2500_v52 = vmax.f32 %v2499_v28, 0.0 }
 0x2ed   :  { %v2502_v53 = vadd.f32 1e-05, %v2500_v52 }
 0x2ef   :  { %6273 = vrsqrt.f32 %v2502_v53 }
 0x2f9   :  { %v6274_v25 = vpop.eup %6273 }
 0x2fa   :  { %v2511_v63 = vrot.slane %v6274_v25, %v7213_v60 }
 0x2fc   :  { %v2512_v36 = vcombine.high %v2511_v63, %v2511_v63  ;;  %v6091_v63 = vpack.c.bf16 %v2907_v30, %v2906_v59 }
 0x2fe   :  { %v2519_v1 = vrot.slane %v2512_v36, %v7213_v60 }
 0x300   :  { %v2521_v3 = vmul.f32 %v2519_v1, %v2501_v0 }
 0x302   :  { %v2523_v5 = vmul.f32 %v2521_v3, %v2494_v45 }
 0x304   :  { %v2524_v9 = vsub.f32 %v2522_v4, %v2523_v5  ;;  %v3028_v4 = vld [vmem:[%s7726_s7 + $0x30] sm:$0xff]  ;;  %v3029_v5 = vld [vmem:[%s7726_s7 + $0x38] sm:$0xff] }
 0x306   :  { %v2529_v10 = vrot.slane %v2524_v9, %v7223_v7 }
 0x308   :  { %v2531_v26 = vsel %vm2417_vm9, %v2521_v3, %v2529_v10  ;;  %v6094_v10 = vpack.c.bf16 %v3029_v5, %v3028_v4 }
 0x309   :  { %5825 = vmatmul.mubr.msk.f32.vlgmr.msra.gmra.mrb[8].mxu1 %vm2533_vm10, %v2531_v26 }
 0x30a   :  { %5831 = vmatprep.mubr.msk.f32.mxu1 %vm6284_vm2, %v6285_v34  ;;  %6086 = vmatpush3.bf16.msra.mxu1 %v6085_v13 }
 0x30b   :  { %6087 = vmatprep.subr.bf16.mxu1 %v6283_v31 }
 0x3dc   :  { %v2603_v15 = vpop.f32.mrb[8].mxu1 }
 0x3dd   :  { %v2610_v16 = vrot.slane %v2603_v15, %v7223_v7  ;;  %v5826_v17 = vpop.f32.mrb[9].mxu1  ;;  %v2630_v18 = vrot.slane %v2603_v15, %v7237_v27  ;;  %v3150_v15 = vld [vmem:[%s7726_s7 + $0x40] sm:$0xff] }
 0x3df   :  { %v2611_v19 = vmul.f32 %v2610_v16, %v7080_v49  ;;  %v2612_v21 = vmul.f32 %v2610_v16, %v7073_v44  ;;  %v2613_v23 = vmul.f32 %v2610_v16, %v7092_v62  ;;  %v2614_v24 = vmul.f32 %v2610_v16, %v7089_v58 }
 0x3e0   :  { %v2615_v33 = vmul.f32 %v2610_v16, %v7111_v20  ;;  %v2616_v35 = vmul.f32 %v2610_v16, %v7102_v8  ;;  %v2617_v37 = vmul.f32 %v2610_v16, %v7127_v47  ;;  %v2618_v38 = vmul.f32 %v2610_v16, %v7113_v22 }
 0x3e1   :  { %v2631_v39 = vadd.f32 %v2630_v18, %v2611_v19  ;;  %v2632_v40 = vadd.f32 %v2630_v18, %v2612_v21  ;;  %v2633_v41 = vadd.f32 %v2630_v18, %v2613_v23  ;;  %v2634_v42 = vadd.f32 %v2630_v18, %v2614_v24 }
 0x3e2   :  { %v2635_v43 = vadd.f32 %v2630_v18, %v2615_v33  ;;  %v2636_v49 = vadd.f32 %v2630_v18, %v2616_v35  ;;  %v2619_v44 = vmul.f32 %v2610_v16, %v7145_v6  ;;  %v2637_v45 = vadd.f32 %v2630_v18, %v2617_v37  ;;  %v3272_v33 = vld [vmem:[%s7726_s7 + $0x50] sm:$0xff]  ;;  %v3273_v35 = vld [vmem:[%s7726_s7 + $0x58] sm:$0xff] }
 0x3e3   :  { %2647 = vst.msk [vmem:[#allocation2] sm:$0xff] %vm2325_vm4, %v2631_v39  ;;  %2648 = vst.msk [vmem:[#allocation2 + $0x8] sm:$0xff] %vm2325_vm4, %v2632_v40  ;;  %v2638_v58 = vadd.f32 %v2630_v18, %v2618_v38  ;;  %v2620_v62 = vmul.f32 %v2610_v16, %v7136_v55  ;;  %v2621_v8 = vmul.f32 %v2610_v16, %v7161_v32  ;;  %v2672_v55 = vld [vmem:[%s7726_s7] sm:$0xff] }
 0x3e4   :  { %2649 = vst.msk [vmem:[#allocation2 + $0x10] sm:$0xff] %vm2325_vm4, %v2633_v41  ;;  %2650 = vst.msk [vmem:[#allocation2 + $0x18] sm:$0xff] %vm2325_vm4, %v2634_v42  ;;  %v2622_v20 = vmul.f32 %v2610_v16, %v7153_v14  ;;  %v2639_v22 = vadd.f32 %v2630_v18, %v2619_v44  ;;  %v2623_v47 = vmul.f32 %v2610_v16, %v7179_v56  ;;  %v2673_v14 = vld [vmem:[%s7726_s7 + $0x8] sm:$0xff] }
 0x3e5   :  { %2651 = vst.msk [vmem:[#allocation2 + $0x20] sm:$0xff] %vm2325_vm4, %v2635_v43  ;;  %2652 = vst.msk [vmem:[#allocation2 + $0x28] sm:$0xff] %vm2325_vm4, %v2636_v49  ;;  %v2624_v6 = vmul.f32 %v2610_v16, %v7175_v51  ;;  %v2625_v46 = vmul.f32 %v2610_v16, %v7192_v2  ;;  %v2640_v32 = vadd.f32 %v2630_v18, %v2620_v62  ;;  %v3394_v43 = vld [vmem:[%s7726_s7 + $0x60] sm:$0xff]  ;;  %v3395_v49 = vld [vmem:[%s7726_s7 + $0x68] sm:$0xff] }
 0x3e6   :  { %2653 = vst.msk [vmem:[#allocation2 + $0x30] sm:$0xff] %vm2325_vm4, %v2637_v45  ;;  %2654 = vst.msk [vmem:[#allocation2 + $0x38] sm:$0xff] %vm2325_vm4, %v2638_v58  ;;  %v2641_v48 = vadd.f32 %v2630_v18, %v2621_v8  ;;  %v2642_v50 = vadd.f32 %v2630_v18, %v2622_v20  ;;  %v2626_v28 = vmul.f32 %v2610_v16, %v7187_v61  ;;  %v3151_v16 = vld [vmem:[%s7726_s7 + $0x48] sm:$0xff] }
 0x3e7   :  { %2655 = vst.msk [vmem:[#allocation2 + $0x40] sm:$0xff] %vm2325_vm4, %v2639_v22  ;;  %v2643_v51 = vadd.f32 %v2630_v18, %v2623_v47  ;;  %v2644_v56 = vadd.f32 %v2630_v18, %v2624_v6  ;;  %v2645_v2 = vadd.f32 %v2630_v18, %v2625_v46  ;;  %2656 = vst.msk [vmem:[#allocation2 + $0x48] sm:$0xff] %vm2325_vm4, %v2640_v32 }
 0x3e8   :  { %2657 = vst.msk [vmem:[#allocation2 + $0x50] sm:$0xff] %vm2325_vm4, %v2641_v48  ;;  %2658 = vst.msk [vmem:[#allocation2 + $0x58] sm:$0xff] %vm2325_vm4, %v2642_v50  ;;  %v2646_v52 = vadd.f32 %v2630_v18, %v2626_v28  ;;  %v6088_v53 = vpack.c.bf16 %v2673_v14, %v2672_v55  ;;  %v6097_v18 = vpack.c.bf16 %v3151_v16, %v3150_v15 }
 0x3e9   :  { %2659 = vst.msk [vmem:[#allocation2 + $0x60] sm:$0xff] %vm2325_vm4, %v2643_v51  ;;  %2660 = vst.msk [vmem:[#allocation2 + $0x68] sm:$0xff] %vm2325_vm4, %v2644_v56  ;;  %v6100_v38 = vpack.c.bf16 %v3273_v35, %v3272_v33  ;;  %v6103_v45 = vpack.c.bf16 %v3395_v49, %v3394_v43 }
 0x3ea   :  { %2661 = vst.msk [vmem:[#allocation2 + $0x70] sm:$0xff] %vm2325_vm4, %v2645_v2 }
 0x3eb   :  { %2662 = vst.msk [vmem:[#allocation2 + $0x78] sm:$0x1f] %vm2355_vm8, %v2646_v52  ;;  %v2675_v61 = vld [vmem:[#allocation2 + $0x1] ss:$3 sm:$0xff]  ;;  %v2663_v36 = vld [vmem:[#allocation2] ss:$3 sm:$0xff] }
 0x3ec   :  { %5832 = vmatmul.mubr.msk.f32.vlgmr.msra.gmra.mrb[10].mxu1 %vm2325_vm4, %v2675_v61  ;;  %v2677_v29 = vld [vmem:[#allocation2 + $0x19] ss:$3 sm:$0xff]  ;;  %v2665_v0 = vld [vmem:[#allocation2 + $0x18] ss:$3 sm:$0xff]  ;;  %v2899_v11 = vld [vmem:[#allocation2 + $0x1a] ss:$3 sm:$0xff] }
 0x3ed   :  { %5834 = vmatprep.mubr.msk.f32.mxu1 %vm6284_vm2, %v6285_v34  ;;  %6089 = vmatpush3.bf16.msra.mxu1 %v6088_v53  ;;  %v2897_v26 = vld [vmem:[#allocation2 + $0x2] ss:$3 sm:$0xff]  ;;  %v3019_v19 = vld [vmem:[#allocation2 + $0x3] ss:$3 sm:$0xff]  ;;  %v3021_v21 = vld [vmem:[#allocation2 + $0x1b] ss:$3 sm:$0xff] }
 0x3ee   :  { %6090 = vmatprep.subr.bf16.mxu1 %v6283_v31  ;;  %v2679_v54 = vld [vmem:[#allocation2 + $0x31] ss:$3 sm:$0xff]  ;;  %v2667_v1 = vld [vmem:[#allocation2 + $0x30] ss:$3 sm:$0xff]  ;;  %v2901_v12 = vld [vmem:[#allocation2 + $0x32] ss:$3 sm:$0xff] }
 0x3ef   :  { %v2681_v57 = vld [vmem:[#allocation2 + $0x49] ss:$3 sm:$0xff]  ;;  %v2669_v3 = vld [vmem:[#allocation2 + $0x48] ss:$3 sm:$0xff]  ;;  %v2903_v13 = vld [vmem:[#allocation2 + $0x4a] ss:$3 sm:$0xff] }
 0x3f0   :  { %5835 = vmatmul.mubr.msk.f32.gmra.mrb[12].mxu1 %vm2325_vm4, %v2677_v29  ;;  %v3023_v23 = vld [vmem:[#allocation2 + $0x33] ss:$3 sm:$0xff]  ;;  %v3025_v24 = vld [vmem:[#allocation2 + $0x4b] ss:$3 sm:$0xff]  ;;  %v3147_v42 = vld [vmem:[#allocation2 + $0x4c] ss:$3 sm:$0xff] }
 0x3f1   :  { %5837 = vmatprep.mubr.msk.f32.mxu1 %vm6284_vm2, %v6285_v34  ;;  %v2683_v25 = vld [vmem:[#allocation2 + $0x61] ss:$3 sm:$0xff]  ;;  %v2671_v9 = vld [vmem:[#allocation2 + $0x60] ss:$3 sm:$0xff]  ;;  %v2905_v17 = vld [vmem:[#allocation2 + $0x62] ss:$3 sm:$0xff] }
 0x3f2   :  { %v3027_v37 = vld [vmem:[#allocation2 + $0x63] ss:$3 sm:$0xff]  ;;  %v3141_v39 = vld [vmem:[#allocation2 + $0x4] ss:$3 sm:$0xff]  ;;  %v3143_v40 = vld [vmem:[#allocation2 + $0x1c] ss:$3 sm:$0xff] }
 0x3f3   :  { %v3145_v41 = vld [vmem:[#allocation2 + $0x34] ss:$3 sm:$0xff]  ;;  %v3149_v44 = vld [vmem:[#allocation2 + $0x64] ss:$3 sm:$0xff] }
 0x3f4   :  { %5838 = vmatmul.mubr.msk.f32.gmra.mrb[14].mxu1 %vm2325_vm4, %v2679_v54  ;;  %v3263_v58 = vld [vmem:[#allocation2 + $0x5] ss:$3 sm:$0xff]  ;;  %v3265_v62 = vld [vmem:[#allocation2 + $0x1d] ss:$3 sm:$0xff]  ;;  %v3267_v8 = vld [vmem:[#allocation2 + $0x35] ss:$3 sm:$0xff] }
 0x3f5   :  { %5840 = vmatprep.mubr.msk.f32.mxu1 %vm6284_vm2, %v6285_v34  ;;  %v3269_v20 = vld [vmem:[#allocation2 + $0x4d] ss:$3 sm:$0xff]  ;;  %v3271_v22 = vld [vmem:[#allocation2 + $0x65] ss:$3 sm:$0xff]  ;;  %v3385_v47 = vld [vmem:[#allocation2 + $0x6] ss:$3 sm:$0xff] }
 0x3f6   :  { %v3387_v6 = vld [vmem:[#allocation2 + $0x1e] ss:$3 sm:$0xff]  ;;  %v3389_v46 = vld [vmem:[#allocation2 + $0x36] ss:$3 sm:$0xff]  ;;  %v3391_v55 = vld [vmem:[#allocation2 + $0x4e] ss:$3 sm:$0xff] }
 0x3f7   :  { %v3393_v14 = vld [vmem:[#allocation2 + $0x66] ss:$3 sm:$0xff] }
 0x3f8   :  { %5841 = vmatmul.mubr.msk.f32.gmra.mrb[16].mxu1 %vm2325_vm4, %v2681_v57 }
 0x3f9   :  { %5843 = vmatprep.mubr.msk.f32.mxu1 %vm6284_vm2, %v6285_v34 }
 0x3fc   :  { %5844 = vmatmul.mubr.msk.f32.gmra.mrb[18].mxu1 %vm2325_vm4, %v2683_v25 }
 0x3fd   :  { %5850 = vmatprep.mubr.msk.f32.mxu1 %vm6284_vm2, %v6285_v34 }
 0x400   :  { %5851 = vmatmul.mubr.msk.f32.vlgmr.msra.gmra.mrb[20].mxu1 %vm2325_vm4, %v2663_v36 }
 0x401   :  { %5853 = vmatprep.mubr.msk.f32.mxu1 %vm6284_vm2, %v6285_v34  ;;  %6092 = vmatpush3.bf16.msra.mxu1 %v6091_v63  ;;  %v3569_v63 = vld [vmem:[%s7727_s30] sm:$0xff] }
 0x402   :  { %6093 = vmatprep.subr.bf16.mxu1 %v6283_v31 }
 0x404   :  { %5854 = vmatmul.mubr.msk.f32.gmra.mrb[22].mxu1 %vm2325_vm4, %v2665_v0 }
 0x405   :  { %5856 = vmatprep.mubr.msk.f32.mxu1 %vm6284_vm2, %v6285_v34 }
 0x408   :  { %5857 = vmatmul.mubr.msk.f32.gmra.mrb[24].mxu1 %vm2325_vm4, %v2667_v1 }
 0x409   :  { %5859 = vmatprep.mubr.msk.f32.mxu1 %vm6284_vm2, %v6285_v34 }
 0x40c   :  { %5860 = vmatmul.mubr.msk.f32.gmra.mrb[26].mxu1 %vm2325_vm4, %v2669_v3 }
 0x40d   :  { %5862 = vmatprep.mubr.msk.f32.mxu1 %vm6284_vm2, %v6285_v34 }
 0x410   :  { %5863 = vmatmul.mubr.msk.f32.gmra.mrb[28].mxu1 %vm2325_vm4, %v2671_v9 }
 0x411   :  { %5869 = vmatprep.mubr.msk.f32.mxu1 %vm6284_vm2, %v6285_v34 }
 0x414   :  { %5870 = vmatmul.mubr.msk.f32.vlgmr.msra.gmra.mrb[30].mxu1 %vm2325_vm4, %v2897_v26 }
 0x415   :  { %5872 = vmatprep.mubr.msk.f32.mxu1 %vm6284_vm2, %v6285_v34  ;;  %6095 = vmatpush3.bf16.msra.mxu1 %v6094_v10 }
 0x416   :  { %6096 = vmatprep.subr.bf16.mxu1 %v6283_v31 }
 0x418   :  { %5873 = vmatmul.mubr.msk.f32.gmra.mrb[32].mxu1 %vm2325_vm4, %v2899_v11 }
 0x419   :  { %5875 = vmatprep.mubr.msk.f32.mxu1 %vm6284_vm2, %v6285_v34 }
 0x41c   :  { %5876 = vmatmul.mubr.msk.f32.gmra.mrb[34].mxu1 %vm2325_vm4, %v2901_v12 }
 0x41d   :  { %5878 = vmatprep.mubr.msk.f32.mxu1 %vm6284_vm2, %v6285_v34 }
 0x420   :  { %5879 = vmatmul.mubr.msk.f32.gmra.mrb[36].mxu1 %vm2325_vm4, %v2903_v13 }
 0x421   :  { %5881 = vmatprep.mubr.msk.f32.mxu1 %vm6284_vm2, %v6285_v34 }
 0x424   :  { %5882 = vmatmul.mubr.msk.f32.gmra.mrb[38].mxu1 %vm2325_vm4, %v2905_v17 }
 0x425   :  { %5888 = vmatprep.mubr.msk.f32.mxu1 %vm6284_vm2, %v6285_v34 }
 0x428   :  { %5889 = vmatmul.mubr.msk.f32.vlgmr.msra.gmra.mrb[40].mxu1 %vm2325_vm4, %v3019_v19 }
 0x429   :  { %5891 = vmatprep.mubr.msk.f32.mxu1 %vm6284_vm2, %v6285_v34  ;;  %6098 = vmatpush3.bf16.msra.mxu1 %v6097_v18 }
 0x42a   :  { %6099 = vmatprep.subr.bf16.mxu1 %v6283_v31 }
 0x42c   :  { %5892 = vmatmul.mubr.msk.f32.gmra.mrb[42].mxu1 %vm2325_vm4, %v3021_v21 }
 0x42d   :  { %5894 = vmatprep.mubr.msk.f32.mxu1 %vm6284_vm2, %v6285_v34 }
 0x430   :  { %5895 = vmatmul.mubr.msk.f32.gmra.mrb[44].mxu1 %vm2325_vm4, %v3023_v23 }
 0x431   :  { %5897 = vmatprep.mubr.msk.f32.mxu1 %vm6284_vm2, %v6285_v34 }
 0x434   :  { %5898 = vmatmul.mubr.msk.f32.gmra.mrb[46].mxu1 %vm2325_vm4, %v3025_v24 }
 0x435   :  { %5900 = vmatprep.mubr.msk.f32.mxu1 %vm6284_vm2, %v6285_v34 }
 0x438   :  { %5901 = vmatmul.mubr.msk.f32.gmra.mrb[48].mxu1 %vm2325_vm4, %v3027_v37 }
 0x439   :  { %5907 = vmatprep.mubr.msk.f32.mxu1 %vm6284_vm2, %v6285_v34 }
 0x43c   :  { %5908 = vmatmul.mubr.msk.f32.vlgmr.msra.gmra.mrb[50].mxu1 %vm2325_vm4, %v3141_v39 }
 0x43d   :  { %5910 = vmatprep.mubr.msk.f32.mxu1 %vm6284_vm2, %v6285_v34  ;;  %6101 = vmatpush3.bf16.msra.mxu1 %v6100_v38 }
 0x43e   :  { %6102 = vmatprep.subr.bf16.mxu1 %v6283_v31 }
 0x440   :  { %5911 = vmatmul.mubr.msk.f32.gmra.mrb[52].mxu1 %vm2325_vm4, %v3143_v40 }
 0x441   :  { %5913 = vmatprep.mubr.msk.f32.mxu1 %vm6284_vm2, %v6285_v34 }
 0x444   :  { %5914 = vmatmul.mubr.msk.f32.gmra.mrb[54].mxu1 %vm2325_vm4, %v3145_v41 }
 0x445   :  { %5916 = vmatprep.mubr.msk.f32.mxu1 %vm6284_vm2, %v6285_v34 }
 0x448   :  { %5917 = vmatmul.mubr.msk.f32.gmra.mrb[56].mxu1 %vm2325_vm4, %v3147_v42 }
 0x449   :  { %5919 = vmatprep.mubr.msk.f32.mxu1 %vm6284_vm2, %v6285_v34 }
 0x44c   :  { %5920 = vmatmul.mubr.msk.f32.gmra.mrb[58].mxu1 %vm2325_vm4, %v3149_v44 }
 0x44d   :  { %5926 = vmatprep.mubr.msk.f32.mxu1 %vm6284_vm2, %v6285_v34 }
 0x450   :  { %5927 = vmatmul.mubr.msk.f32.vlgmr.msra.gmra.mrb[60].mxu1 %vm2325_vm4, %v3263_v58 }
 0x451   :  { %5929 = vmatprep.mubr.msk.f32.mxu1 %vm6284_vm2, %v6285_v34  ;;  %6104 = vmatpush3.bf16.msra.mxu1 %v6103_v45 }
 0x452   :  { %5960 = vmatprep.subr.mxu1 %v6285_v34 }
 0x454   :  { %5930 = vmatmul.mubr.msk.f32.gmra.mrb[62].mxu1 %vm2325_vm4, %v3265_v62 }
 0x455   :  { %5932 = vmatprep.mubr.msk.f32.mxu1 %vm6284_vm2, %v6285_v34 }
 0x458   :  { %5933 = vmatmul.mubr.msk.f32.gmra.mrb[64].mxu1 %vm2325_vm4, %v3267_v8 }
 0x459   :  { %5935 = vmatprep.mubr.msk.f32.mxu1 %vm6284_vm2, %v6285_v34 }
 0x45c   :  { %5936 = vmatmul.mubr.msk.f32.gmra.mrb[66].mxu1 %vm2325_vm4, %v3269_v20 }
 0x45d   :  { %5938 = vmatprep.mubr.msk.f32.mxu1 %vm6284_vm2, %v6285_v34 }
 0x460   :  { %5939 = vmatmul.mubr.msk.f32.gmra.mrb[68].mxu1 %vm2325_vm4, %v3271_v22 }
 0x461   :  { %5945 = vmatprep.mubr.msk.f32.mxu1 %vm6284_vm2, %v6285_v34 }
 0x464   :  { %5946 = vmatmul.mubr.msk.f32.vlgmr.msra.gmra.mrb[70].mxu1 %vm2325_vm4, %v3385_v47 }
 0x465   :  { %5948 = vmatprep.mubr.msk.f32.mxu1 %vm6284_vm2, %v6285_v34  ;;  %5961 = vmatpush3.msra.mxu1 %v3569_v63 }
 0x466   :  { %5965 = vmatprep.subr.mxu1 %v6285_v34 }
 0x468   :  { %5949 = vmatmul.mubr.msk.f32.gmra.mrb[72].mxu1 %vm2325_vm4, %v3387_v6 }
 0x469   :  { %5951 = vmatprep.mubr.msk.f32.mxu1 %vm6284_vm2, %v6285_v34 }
 0x46c   :  { %5952 = vmatmul.mubr.msk.f32.gmra.mrb[74].mxu1 %vm2325_vm4, %v3389_v46 }
 0x46d   :  { %5954 = vmatprep.mubr.msk.f32.mxu1 %vm6284_vm2, %v6285_v34 }
 0x470   :  { %5955 = vmatmul.mubr.msk.f32.gmra.mrb[76].mxu1 %vm2325_vm4, %v3391_v55 }
 0x471   :  { %5957 = vmatprep.mubr.msk.f32.mxu1 %vm6284_vm2, %v6285_v34 }
 0x474   :  { %5958 = vmatmul.mubr.msk.f32.gmra.mrb[78].mxu1 %vm2325_vm4, %v3393_v14 }
 0x475   :  { %5962 = vmatprep.mubr.msk.f32.mxu1 %vm6284_vm2, %v6285_v34 }
 0x4bf   :  { %v2767_v32 = vpop.f32.mrb[10].mxu1 }
 0x4c0   :  { %v5833_v48 = vpop.f32.mrb[11].mxu1 }
 0x4c3   :  { %v2772_v50 = vpop.f32.mrb[12].mxu1 }
 0x4c4   :  { %v5836_v28 = vpop.f32.mrb[13].mxu1 }
 0x4c7   :  { %v2777_v51 = vpop.f32.mrb[14].mxu1 }
 0x4c8   :  { %v5839_v56 = vpop.f32.mrb[15].mxu1 }
 0x4cb   :  { %v2782_v2 = vpop.f32.mrb[16].mxu1 }
 0x4cc   :  { %v5842_v52 = vpop.f32.mrb[17].mxu1 }
 0x4cf   :  { %v2787_v53 = vpop.f32.mrb[18].mxu1 }
 0x4d0   :  { %v5845_v61 = vpop.f32.mrb[19].mxu1 }
 0x4d3   :  { %v2872_v29 = vpop.f32.mrb[20].mxu1 }
 0x4d4   :  { %v2873_v54 = vadd.f32 %v2872_v29, %v2767_v32  ;;  %v5852_v57 = vpop.f32.mrb[21].mxu1 }
 0x4d7   :  { %v2877_v59 = vpop.f32.mrb[22].mxu1 }
 0x4d8   :  { %v2878_v30 = vadd.f32 %v2877_v59, %v2772_v50  ;;  %v5855_v25 = vpop.f32.mrb[23].mxu1 }
 0x4db   :  { %v2882_v36 = vpop.f32.mrb[24].mxu1 }
 0x4dc   :  { %v2883_v0 = vadd.f32 %v2882_v36, %v2777_v51  ;;  %v5858_v1 = vpop.f32.mrb[25].mxu1 }
 0x4df   :  { %v2887_v3 = vpop.f32.mrb[26].mxu1 }
 0x4e0   :  { %v2888_v4 = vadd.f32 %v2887_v3, %v2782_v2  ;;  %v5861_v5 = vpop.f32.mrb[27].mxu1 }
 0x4e3   :  { %v2892_v9 = vpop.f32.mrb[28].mxu1 }
 0x4e4   :  { %v2893_v10 = vadd.f32 %v2892_v9, %v2787_v53  ;;  %v5864_v26 = vpop.f32.mrb[29].mxu1 }
 0x4e7   :  { %v2989_v11 = vpop.f32.mrb[30].mxu1 }
 0x4e8   :  { %v3013_v12 = vadd.f32 %v2989_v11, %v2873_v54  ;;  %v5871_v13 = vpop.f32.mrb[31].mxu1 }
 0x4eb   :  { %v2994_v15 = vpop.f32.mrb[32].mxu1 }
 0x4ec   :  { %v3014_v16 = vadd.f32 %v2994_v15, %v2878_v30  ;;  %v5874_v17 = vpop.f32.mrb[33].mxu1 }
 0x4ef   :  { %v2999_v18 = vpop.f32.mrb[34].mxu1 }
 0x4f0   :  { %v3015_v19 = vadd.f32 %v2999_v18, %v2883_v0  ;;  %v5877_v21 = vpop.f32.mrb[35].mxu1 }
 0x4f3   :  { %v3004_v23 = vpop.f32.mrb[36].mxu1 }
 0x4f4   :  { %v3016_v24 = vadd.f32 %v3004_v23, %v2888_v4  ;;  %v5880_v33 = vpop.f32.mrb[37].mxu1 }
 0x4f7   :  { %v3009_v35 = vpop.f32.mrb[38].mxu1 }
 0x4f8   :  { %v3017_v37 = vadd.f32 %v3009_v35, %v2893_v10  ;;  %v5883_v38 = vpop.f32.mrb[39].mxu1 }
 0x4fb   :  { %v3111_v39 = vpop.f32.mrb[40].mxu1 }
 0x4fc   :  { %v3135_v40 = vadd.f32 %v3111_v39, %v3013_v12  ;;  %v5890_v41 = vpop.f32.mrb[41].mxu1 }
 0x4ff   :  { %v3116_v42 = vpop.f32.mrb[42].mxu1 }
 0x500   :  { %v3136_v43 = vadd.f32 %v3116_v42, %v3014_v16  ;;  %v5893_v49 = vpop.f32.mrb[43].mxu1  ;;  %v5289_v16 = vld [vmem:[%s7728_s11] ss:$0 sm:$0xff] }
 0x503   :  { %v3121_v44 = vpop.f32.mrb[44].mxu1 }
 0x504   :  { %v3137_v45 = vadd.f32 %v3121_v44, %v3015_v19  ;;  %v5896_v58 = vpop.f32.mrb[45].mxu1 }
 0x507   :  { %v3126_v62 = vpop.f32.mrb[46].mxu1 }
 0x508   :  { %v3138_v8 = vadd.f32 %v3126_v62, %v3016_v24  ;;  %v5899_v20 = vpop.f32.mrb[47].mxu1 }
 0x50b   :  { %v3131_v22 = vpop.f32.mrb[48].mxu1 }
 0x50c   :  { %v3139_v47 = vadd.f32 %v3131_v22, %v3017_v37  ;;  %v5902_v6 = vpop.f32.mrb[49].mxu1 }
 0x50f   :  { %v3233_v46 = vpop.f32.mrb[50].mxu1 }
 0x510   :  { %v3257_v55 = vadd.f32 %v3233_v46, %v3135_v40  ;;  %v5909_v14 = vpop.f32.mrb[51].mxu1 }
 0x513   :  { %v3238_v32 = vpop.f32.mrb[52].mxu1 }
 0x514   :  { %v3258_v48 = vadd.f32 %v3238_v32, %v3136_v43  ;;  %v5912_v50 = vpop.f32.mrb[53].mxu1 }
 0x517   :  { %v3243_v28 = vpop.f32.mrb[54].mxu1 }
 0x518   :  { %v3259_v51 = vadd.f32 %v3243_v28, %v3137_v45  ;;  %v5915_v56 = vpop.f32.mrb[55].mxu1 }
 0x51b   :  { %v3248_v2 = vpop.f32.mrb[56].mxu1 }
 0x51c   :  { %v3260_v52 = vadd.f32 %v3248_v2, %v3138_v8  ;;  %v5918_v53 = vpop.f32.mrb[57].mxu1 }
 0x51f   :  { %v3253_v61 = vpop.f32.mrb[58].mxu1 }
 0x520   :  { %v3261_v29 = vadd.f32 %v3253_v61, %v3139_v47  ;;  %v5921_v54 = vpop.f32.mrb[59].mxu1 }
 0x523   :  { %v3355_v57 = vpop.f32.mrb[60].mxu1 }
 0x524   :  { %v3379_v59 = vadd.f32 %v3355_v57, %v3257_v55  ;;  %v5928_v30 = vpop.f32.mrb[61].mxu1 }
 0x527   :  { %v3360_v25 = vpop.f32.mrb[62].mxu1 }
 0x528   :  { %v3380_v63 = vadd.f32 %v3360_v25, %v3258_v48  ;;  %v5931_v36 = vpop.f32.mrb[63].mxu1 }
 0x52b   :  { %v3365_v0 = vpop.f32.mrb[64].mxu1 }
 0x52c   :  { %v3381_v1 = vadd.f32 %v3365_v0, %v3259_v51  ;;  %v5934_v3 = vpop.f32.mrb[65].mxu1 }
 0x52f   :  { %v3370_v4 = vpop.f32.mrb[66].mxu1 }
 0x530   :  { %v3382_v5 = vadd.f32 %v3370_v4, %v3260_v52  ;;  %v5937_v9 = vpop.f32.mrb[67].mxu1 }
 0x533   :  { %v3375_v10 = vpop.f32.mrb[68].mxu1 }
 0x534   :  { %v3383_v26 = vadd.f32 %v3375_v10, %v3261_v29  ;;  %v5940_v11 = vpop.f32.mrb[69].mxu1 }
 0x537   :  { %v3477_v12 = vpop.f32.mrb[70].mxu1 }
 0x538   :  { %v3501_v13 = vadd.f32 %v3477_v12, %v3379_v59  ;;  %v5947_v15 = vpop.f32.mrb[71].mxu1 }
 0x53a   :  { %v3513_v18 = vadd.f32 %v5289_v16, %v3501_v13 }
 0x53b   :  { %v3482_v17 = vpop.f32.mrb[72].mxu1 }
 0x53c   :  { %v3502_v19 = vadd.f32 %v3482_v17, %v3380_v63  ;;  %v5950_v21 = vpop.f32.mrb[73].mxu1  ;;  %v3523_v33 = vmul.f32 0.01, %v3513_v18  ;;  %vm3518_vm11 = vcmp.gt.f32.partialorder %v3513_v18, 0.0 }
 0x53e   :  { %v3514_v23 = vadd.f32 %v5289_v16, %v3502_v19  ;;  %v7429_v42 = vsel %vm3518_vm11, %v3513_v18, %v3523_v33 }
 0x53f   :  { %v3487_v24 = vpop.f32.mrb[74].mxu1  ;;  %v3548_v8 = vmul.f32 %v7429_v42, %v7429_v42  ;;  %v3533_v14 = vsel %vm2533_vm10, %v7429_v42, 0.0 }
 0x540   :  { %vm3519_vm4 = vcmp.gt.f32.partialorder %v3514_v23, 0.0  ;;  %v3524_v35 = vmul.f32 0.01, %v3514_v23  ;;  %v3503_v37 = vadd.f32 %v3487_v24, %v3381_v1  ;;  %v5953_v38 = vpop.f32.mrb[75].mxu1 }
 0x541   :  { %v3553_v56 = vsel %vm2533_vm10, %v3548_v8, 0.0 }
 0x542   :  { %v7427_v39 = vsel %vm3519_vm4, %v3514_v23, %v3524_v35  ;;  %v3515_v40 = vadd.f32 %v5289_v16, %v3503_v37  ;;  %v3681_v23 = vld [vmem:[%s7689_s12] sm:$0xf] }
 0x543   :  { %v3492_v41 = vpop.f32.mrb[76].mxu1  ;;  %v3549_v45 = vmul.f32 %v7427_v39, %v7427_v39  ;;  %v3534_v20 = vsel %vm2533_vm10, %v7427_v39, 0.0 }
 0x544   :  { %vm3520_vm12 = vcmp.gt.f32.partialorder %v3515_v40, 0.0  ;;  %v3525_v43 = vmul.f32 0.01, %v3515_v40  ;;  %v3504_v49 = vadd.f32 %v3492_v41, %v3382_v5  ;;  %v5956_v44 = vpop.f32.mrb[77].mxu1  ;;  %v3535_v50 = vadd.f32 %v3534_v20, %v3533_v14  ;;  %v3793_v14 = vld [vmem:[%s7692_s13 + $0x8] sm:$0xff] }
 0x545   :  { %v3554_v32 = vsel %vm2533_vm10, %v3549_v45, 0.0 }
 0x546   :  { %v7433_v58 = vsel %vm3520_vm12, %v3515_v40, %v3525_v43  ;;  %v3516_v62 = vadd.f32 %v5289_v16, %v3504_v49  ;;  %v3555_v61 = vadd.f32 %v3554_v32, %v3553_v56 }
 0x547   :  { %v3550_v22 = vmul.f32 %v7433_v58, %v7433_v58  ;;  %v3497_v47 = vpop.f32.mrb[78].mxu1  ;;  %v3536_v48 = vsel %vm2533_vm10, %v7433_v58, 0.0 }
 0x548   :  { %vm3521_vm13 = vcmp.gt.f32.partialorder %v3516_v62, 0.0  ;;  %v3526_v6 = vmul.f32 0.01, %v3516_v62  ;;  %v3505_v46 = vadd.f32 %v3497_v47, %v3383_v26  ;;  %v5959_v55 = vpop.f32.mrb[79].mxu1  ;;  %v3537_v29 = vadd.f32 %v3536_v48, %v3535_v50 }
 0x549   :  { %v3556_v2 = vsel %vm2533_vm10, %v3550_v22, 0.0  ;;  %v3671_v22 = vld [vmem:[%s7691_s10] sm:$0x1] }
 0x54a   :  { %v7446_v28 = vsel %vm3521_vm13, %v3516_v62, %v3526_v6  ;;  %v3517_v51 = vadd.f32 %v5289_v16, %v3505_v46  ;;  %v3557_v59 = vadd.f32 %v3556_v2, %v3555_v61  ;;  %v3650_v62 = vld [vmem:[%s7690_s9] sm:$0x1]  ;;  %s6288_s9 = smov 126   ;;  %vm6290_vm13 = vmmov 1  }
 0x54b   :  { %v3538_v52 = vsel %vm2533_vm10, %v7446_v28, 0.0  ;;  %v3551_v53 = vmul.f32 %v7446_v28, %v7446_v28 }
 0x54c   :  { %vm3522_vm14 = vcmp.gt.f32.partialorder %v3517_v51, 0.0  ;;  %v3527_v54 = vmul.f32 0.01, %v3517_v51  ;;  %v3539_v30 = vadd.f32 %v3538_v52, %v3537_v29 }
 0x54d   :  { %v3558_v57 = vsel %vm2533_vm10, %v3551_v53, 0.0 }
 0x54e   :  { %v3532_v25 = vsel %vm3522_vm14, %v3517_v51, %v3527_v54  ;;  %v3559_v0 = vadd.f32 %v3558_v57, %v3557_v59  ;;  %vm6117_vm14 = vmpackc.low %vm2417_vm9, %vm6290_vm13 }
 0x54f   :  { %v3540_v63 = vsel %vm2533_vm10, %v3532_v25, 0.0  ;;  %v3552_v36 = vmul.f32 %v3532_v25, %v3532_v25 }
 0x550   :  { %v3541_v1 = vadd.f32 %v3540_v63, %v3539_v30 }
 0x551   :  { %v3560_v3 = vsel %vm2533_vm10, %v3552_v36, 0.0 }
 0x552   :  { %v3542_v4 = vrot.slane %v3541_v1, 4  ;;  %v3561_v5 = vadd.f32 %v3560_v3, %v3559_v0 }
 0x554   :  { %v3543_v9 = vadd.f32 %v3542_v4, %v3541_v1  ;;  %v3562_v10 = vrot.slane %v3561_v5, 4  ;;  %v4077_v1 = vld [vmem:[%s7692_s13 + $0x18] sm:$0xff] }
 0x556   :  { %v3544_v26 = vrot.slane %v3543_v9, 2  ;;  %v3563_v11 = vadd.f32 %v3562_v10, %v3561_v5 }
 0x558   :  { %v3545_v12 = vadd.f32 %v3544_v26, %v3543_v9  ;;  %v3564_v13 = vrot.slane %v3563_v11, 2  ;;  %v4176_v9 = vld [vmem:[%s7692_s13 + $0x20] sm:$0xff] }
 0x55a   :  { %v3546_v15 = vrot.slane %v3545_v12, 1  ;;  %v3565_v16 = vadd.f32 %v3564_v13, %v3563_v11 }
 0x55c   :  { %v3566_v17 = vrot.slane %v3565_v16, 1  ;;  %v3547_v18 = vadd.f32 %v3546_v15, %v3545_v12 }
 0x55e   :  { %v3567_v19 = vadd.f32 %v3566_v17, %v3565_v16  ;;  %v4315_v16 = vld [vmem:[%s7693_s17] sm:$0xf] }
 0x560   :  { %v3568_v21 = vsel %vm2417_vm9, %v3547_v18, %v3567_v19 }
 0x561   :  { %5963 = vmatmul.mubr.msk.f32.vlgmr.msra.gmra.mrb[80].mxu1 %vm2533_vm10, %v3568_v21 }
 0x562   :  { %5967 = vmatprep.mubr.msk.f32.mxu1 %vm6284_vm2, %v6285_v34  ;;  %5966 = vmatpush3.msk.msra.mxu1 %vm194_vm0, %v3681_v23 }
 0x563   :  { %5970 = vmatprep.subr.mxu1 %v6285_v34 }
 0x634   :  { %v3639_v24 = vpop.f32.mrb[80].mxu1 }
 0x635   :  { %v3643_v33 = vmul.f32 0.0125, %v3639_v24  ;;  %v5964_v35 = vpop.f32.mrb[81].mxu1 }
 0x637   :  { %v3644_v37 = vmul.f32 %v3643_v33, %v3643_v33 }
 0x639   :  { %v3646_v38 = vrot.slane %v3644_v37, 7 }
 0x63b   :  { %v3648_v40 = vsub.f32 %v3643_v33, %v3646_v38 }
 0x63d   :  { %v3649_v41 = vmax.f32 %v3648_v40, 0.0 }
 0x63f   :  { %v3651_v43 = vadd.f32 1e-05, %v3649_v41 }
 0x641   :  { %6275 = vrsqrt.f32 %v3651_v43 }
 0x64b   :  { %v6276_v49 = vpop.eup %6275 }
 0x64c   :  { %v3660_v44 = vrot.slane %v6276_v49, %v7213_v60 }
 0x64e   :  { %v3661_v45 = vcombine.high %v3660_v44, %v3660_v44 }
 0x650   :  { %v3668_v8 = vrot.slane %v3661_v45, %v7213_v60 }
 0x652   :  { %v3670_v20 = vmul.f32 %v3668_v8, %v3650_v62 }
 0x654   :  { %v3672_v47 = vmul.f32 %v3670_v20, %v3643_v33 }
 0x656   :  { %v3673_v6 = vsub.f32 %v3671_v22, %v3672_v47 }
 0x658   :  { %v3678_v46 = vrot.slane %v3673_v6, %v7223_v7 }
 0x65a   :  { %v3680_v55 = vsel %vm2417_vm9, %v3670_v20, %v3678_v46 }
 0x65b   :  { %5968 = vmatmul.mubr.msk.f32.vlgmr.msra.gmra.mrb[82].mxu1 %vm145_vm1, %v3680_v55 }
 0x65c   :  { %5972 = vmatprep.mubr.msk.f32.mxu1 %vm6284_vm2, %v6285_v34  ;;  %5971 = vmatpush3.msra.mxu1 %v3793_v14 }
 0x65d   :  { %5981 = vmatprep.subr.mxu1 %v6285_v34 }
 0x72e   :  { %v3754_v32 = vpop.f32.mrb[82].mxu1 }
 0x72f   :  { %v3761_v48 = vrot.slane %v3754_v32, %v7223_v7  ;;  %v5969_v50 = vpop.f32.mrb[83].mxu1  ;;  %v3770_v51 = vrot.slane %v3754_v32, %v7237_v27 }
 0x731   :  { %v3762_v56 = vmul.f32 %v3761_v48, %v7429_v42  ;;  %v3763_v2 = vmul.f32 %v3761_v48, %v7427_v39  ;;  %v3764_v52 = vmul.f32 %v3761_v48, %v7433_v58  ;;  %v3765_v53 = vmul.f32 %v3761_v48, %v7446_v28  ;;  %v3786_v39 = vld [vmem:[%s7692_s13] sm:$0xff] }
 0x732   :  { %v3766_v61 = vmul.f32 %v3761_v48, %v3532_v25  ;;  %v3978_v25 = vld [vmem:[%s7692_s13 + $0x10] sm:$0xff] }
 0x733   :  { %v3771_v29 = vadd.f32 %v3770_v51, %v3762_v56  ;;  %v3772_v54 = vadd.f32 %v3770_v51, %v3763_v2  ;;  %v3773_v57 = vadd.f32 %v3770_v51, %v3764_v52  ;;  %v3774_v59 = vadd.f32 %v3770_v51, %v3765_v53 }
 0x734   :  { %v3775_v30 = vadd.f32 %v3770_v51, %v3766_v61 }
 0x735   :  { %3776 = vst.msk [vmem:[#allocation3] sm:$0xff] %vm2533_vm10, %v3771_v29  ;;  %3777 = vst.msk [vmem:[#allocation3 + $0x8] sm:$0xff] %vm2533_vm10, %v3772_v54  ;;  %v5308_v29 = vld [vmem:[%s7694_s14] ss:$0 sm:$0xff] }
 0x736   :  { %3778 = vst.msk [vmem:[#allocation3 + $0x10] sm:$0xff] %vm2533_vm10, %v3773_v57  ;;  %3779 = vst.msk [vmem:[#allocation3 + $0x18] sm:$0xff] %vm2533_vm10, %v3774_v59 }
 0x737   :  { %3780 = vst.msk [vmem:[#allocation3 + $0x20] sm:$0xff] %vm2533_vm10, %v3775_v30 }
 0x73c   :  { %v3788_v42 = vld [vmem:[#allocation3 + $0x1] ss:$2 sm:$0xff]  ;;  %v3781_v63 = vld [vmem:[#allocation3] ss:$2 sm:$0xff] }
 0x73d   :  { %5973 = vmatmul.mubr.msk.f32.vlgmr.msra.gmra.mrb[84].mxu1 %vm2533_vm10, %v3788_v42  ;;  %v3790_v58 = vld [vmem:[#allocation3 + $0x11] ss:$2 sm:$0xff]  ;;  %v3783_v36 = vld [vmem:[#allocation3 + $0x10] ss:$2 sm:$0xff] }
 0x73e   :  { %5975 = vmatprep.mubr.msk.f32.mxu1 %vm6284_vm2, %v6285_v34  ;;  %5982 = vmatpush3.msra.mxu1 %v3786_v39  ;;  %v3792_v28 = vld [vmem:[#allocation3 + $0x21] ss:$2 sm:$0x3]  ;;  %v3785_v0 = vld [vmem:[#allocation3 + $0x20] ss:$2 sm:$0x3] }
 0x73f   :  { %5992 = vmatprep.subr.mxu1 %v6285_v34  ;;  %v3973_v3 = vld [vmem:[#allocation3 + $0x2] ss:$2 sm:$0xff]  ;;  %v3975_v4 = vld [vmem:[#allocation3 + $0x12] ss:$2 sm:$0xff]  ;;  %v4072_v10 = vld [vmem:[#allocation3 + $0x3] ss:$2 sm:$0xff] }
 0x740   :  { %v3977_v5 = vld [vmem:[#allocation3 + $0x22] ss:$2 sm:$0x3]  ;;  %v4074_v26 = vld [vmem:[#allocation3 + $0x13] ss:$2 sm:$0xff] }
 0x741   :  { %5976 = vmatmul.mubr.msk.f32.gmra.mrb[86].mxu1 %vm2533_vm10, %v3790_v58  ;;  %v4076_v11 = vld [vmem:[#allocation3 + $0x23] ss:$2 sm:$0x3]  ;;  %v4171_v12 = vld [vmem:[#allocation3 + $0x4] ss:$2 sm:$0xff] }
 0x742   :  { %5978 = vmatprep.mubr.msk.f32.mxu1 %vm6284_vm2, %v6285_v34  ;;  %v4173_v13 = vld [vmem:[#allocation3 + $0x14] ss:$2 sm:$0xff]  ;;  %v4175_v15 = vld [vmem:[#allocation3 + $0x24] ss:$2 sm:$0x3] }
 0x745   :  { %5979 = vmatmul.mubr.msk.f32.gmra.mrb[88].mxu1 %vm2533_vm10, %v3792_v28 }
 0x746   :  { %5983 = vmatprep.mubr.msk.f32.mxu1 %vm6284_vm2, %v6285_v34 }
 0x749   :  { %5984 = vmatmul.mubr.msk.f32.vlgmr.msra.gmra.mrb[90].mxu1 %vm2533_vm10, %v3781_v63 }
 0x74a   :  { %5986 = vmatprep.mubr.msk.f32.mxu1 %vm6284_vm2, %v6285_v34  ;;  %5993 = vmatpush3.msra.mxu1 %v3978_v25 }
 0x74b   :  { %6003 = vmatprep.subr.mxu1 %v6285_v34 }
 0x74d   :  { %5987 = vmatmul.mubr.msk.f32.gmra.mrb[92].mxu1 %vm2533_vm10, %v3783_v36 }
 0x74e   :  { %5989 = vmatprep.mubr.msk.f32.mxu1 %vm6284_vm2, %v6285_v34 }
 0x751   :  { %5990 = vmatmul.mubr.msk.f32.gmra.mrb[94].mxu1 %vm2533_vm10, %v3785_v0 }
 0x752   :  { %5994 = vmatprep.mubr.msk.f32.mxu1 %vm6284_vm2, %v6285_v34 }
 0x755   :  { %5995 = vmatmul.mubr.msk.f32.vlgmr.msra.gmra.mrb[96].mxu1 %vm2533_vm10, %v3973_v3 }
 0x756   :  { %5997 = vmatprep.mubr.msk.f32.mxu1 %vm6284_vm2, %v6285_v34  ;;  %6004 = vmatpush3.msra.mxu1 %v4077_v1 }
 0x757   :  { %6014 = vmatprep.subr.mxu1 %v6285_v34 }
 0x759   :  { %5998 = vmatmul.mubr.msk.f32.gmra.mrb[98].mxu1 %vm2533_vm10, %v3975_v4 }
 0x75a   :  { %6000 = vmatprep.mubr.msk.f32.mxu1 %vm6284_vm2, %v6285_v34 }
 0x75d   :  { %6001 = vmatmul.mubr.msk.f32.gmra.mrb[100].mxu1 %vm2533_vm10, %v3977_v5 }
 0x75e   :  { %6005 = vmatprep.mubr.msk.f32.mxu1 %vm6284_vm2, %v6285_v34 }
 0x761   :  { %6006 = vmatmul.mubr.msk.f32.vlgmr.msra.gmra.mrb[102].mxu1 %vm2533_vm10, %v4072_v10 }
 0x762   :  { %6008 = vmatprep.mubr.msk.f32.mxu1 %vm6284_vm2, %v6285_v34  ;;  %6015 = vmatpush3.msra.mxu1 %v4176_v9 }
 0x763   :  { %6025 = vmatprep.subr.mxu1 %v6285_v34 }
 0x765   :  { %6009 = vmatmul.mubr.msk.f32.gmra.mrb[104].mxu1 %vm2533_vm10, %v4074_v26 }
 0x766   :  { %6011 = vmatprep.mubr.msk.f32.mxu1 %vm6284_vm2, %v6285_v34 }
 0x769   :  { %6012 = vmatmul.mubr.msk.f32.gmra.mrb[106].mxu1 %vm2533_vm10, %v4076_v11 }
 0x76a   :  { %6016 = vmatprep.mubr.msk.f32.mxu1 %vm6284_vm2, %v6285_v34 }
 0x76d   :  { %6017 = vmatmul.mubr.msk.f32.vlgmr.msra.gmra.mrb[108].mxu1 %vm2533_vm10, %v4171_v12 }
 0x76e   :  { %6019 = vmatprep.mubr.msk.f32.mxu1 %vm6284_vm2, %v6285_v34  ;;  %6026 = vmatpush3.msk.msra.mxu1 %vm194_vm0, %v4315_v16 }
 0x76f   :  { %6030 = vmatprep.subr.mxu1 %v6285_v34 }
 0x771   :  { %6020 = vmatmul.mubr.msk.f32.gmra.mrb[110].mxu1 %vm2533_vm10, %v4173_v13 }
 0x772   :  { %6022 = vmatprep.mubr.msk.f32.mxu1 %vm6284_vm2, %v6285_v34 }
 0x775   :  { %6023 = vmatmul.mubr.msk.f32.gmra.mrb[112].mxu1 %vm2533_vm10, %v4175_v15 }
 0x776   :  { %6027 = vmatprep.mubr.msk.f32.mxu1 %vm6284_vm2, %v6285_v34 }
 0x810   :  { %v3869_v17 = vpop.f32.mrb[84].mxu1 }
 0x811   :  { %v5974_v18 = vpop.f32.mrb[85].mxu1 }
 0x814   :  { %v3874_v19 = vpop.f32.mrb[86].mxu1 }
 0x815   :  { %v5977_v21 = vpop.f32.mrb[87].mxu1 }
 0x818   :  { %v3879_v23 = vpop.f32.mrb[88].mxu1 }
 0x819   :  { %v5980_v24 = vpop.f32.mrb[89].mxu1 }
 0x81c   :  { %v3958_v33 = vpop.f32.mrb[90].mxu1 }
 0x81d   :  { %v3959_v35 = vadd.f32 %v3958_v33, %v3869_v17  ;;  %v5985_v37 = vpop.f32.mrb[91].mxu1 }
 0x820   :  { %v3963_v38 = vpop.f32.mrb[92].mxu1 }
 0x821   :  { %v3964_v40 = vadd.f32 %v3963_v38, %v3874_v19  ;;  %v5988_v41 = vpop.f32.mrb[93].mxu1 }
 0x824   :  { %v3968_v43 = vpop.f32.mrb[94].mxu1 }
 0x825   :  { %v3969_v49 = vadd.f32 %v3968_v43, %v3879_v23  ;;  %v5991_v44 = vpop.f32.mrb[95].mxu1 }
 0x828   :  { %v4054_v45 = vpop.f32.mrb[96].mxu1 }
 0x829   :  { %v4068_v62 = vadd.f32 %v4054_v45, %v3959_v35  ;;  %v5996_v8 = vpop.f32.mrb[97].mxu1 }
 0x82c   :  { %v4059_v20 = vpop.f32.mrb[98].mxu1 }
 0x82d   :  { %v4069_v22 = vadd.f32 %v4059_v20, %v3964_v40  ;;  %v5999_v47 = vpop.f32.mrb[99].mxu1 }
 0x830   :  { %v4064_v6 = vpop.f32.mrb[100].mxu1 }
 0x831   :  { %v4070_v46 = vadd.f32 %v4064_v6, %v3969_v49  ;;  %v6002_v55 = vpop.f32.mrb[101].mxu1 }
 0x834   :  { %v4153_v14 = vpop.f32.mrb[102].mxu1 }
 0x835   :  { %v4167_v32 = vadd.f32 %v4153_v14, %v4068_v62  ;;  %v6007_v48 = vpop.f32.mrb[103].mxu1 }
 0x838   :  { %v4158_v50 = vpop.f32.mrb[104].mxu1 }
 0x839   :  { %v4168_v51 = vadd.f32 %v4158_v50, %v4069_v22  ;;  %v6010_v56 = vpop.f32.mrb[105].mxu1  ;;  %v4430_v22 = vld [vmem:[%s7695_s18] sm:$0x3] }
 0x83c   :  { %v4163_v2 = vpop.f32.mrb[106].mxu1 }
 0x83d   :  { %v4169_v52 = vadd.f32 %v4163_v2, %v4070_v46  ;;  %v6013_v53 = vpop.f32.mrb[107].mxu1 }
 0x840   :  { %v4252_v61 = vpop.f32.mrb[108].mxu1 }
 0x841   :  { %v4266_v54 = vadd.f32 %v4252_v61, %v4167_v32  ;;  %v6018_v57 = vpop.f32.mrb[109].mxu1 }
 0x843   :  { %v4276_v59 = vadd.f32 %v5308_v29, %v4266_v54 }
 0x844   :  { %v4257_v30 = vpop.f32.mrb[110].mxu1 }
 0x845   :  { %v4282_v39 = vmul.f32 0.01, %v4276_v59  ;;  %v4267_v42 = vadd.f32 %v4257_v30, %v4168_v51  ;;  %v6021_v58 = vpop.f32.mrb[111].mxu1  ;;  %vm4279_vm0 = vcmp.gt.f32.partialorder %v4276_v59, 0.0 }
 0x847   :  { %v4277_v28 = vadd.f32 %v5308_v29, %v4267_v42  ;;  %v7563_v63 = vsel %vm4279_vm0, %v4276_v59, %v4282_v39  ;;  %v4527_v39 = vld [vmem:[%s7698_s19 + $0x8] sm:$0xff]  ;;  %vm4949_vm0 = vcmask 9216  }
 0x848   :  { %v4262_v25 = vpop.f32.mrb[112].mxu1  ;;  %v4300_v5 = vmul.f32 %v7563_v63, %v7563_v63  ;;  %v4288_v11 = vsel %vm145_vm1, %v7563_v63, 0.0 }
 0x849   :  { %vm4280_vm15 = vcmp.gt.f32.partialorder %v4277_v28, 0.0  ;;  %v4283_v36 = vmul.f32 0.01, %v4277_v28  ;;  %v4268_v0 = vadd.f32 %v4262_v25, %v4169_v52  ;;  %v6024_v1 = vpop.f32.mrb[113].mxu1  ;;  %v4399_v52 = vld [vmem:[%s7696_s15] sm:$0x1] }
 0x84a   :  { %v4303_v16 = vsel %vm145_vm1, %v4300_v5, 0.0 }
 0x84b   :  { %v7565_v3 = vsel %vm4280_vm15, %v4277_v28, %v4283_v36  ;;  %v4278_v4 = vadd.f32 %v5308_v29, %v4268_v0  ;;  %v4420_v29 = vld [vmem:[%s7697_s16] sm:$0x1] }
 0x84c   :  { %v4289_v9 = vsel %vm145_vm1, %v7565_v3, 0.0  ;;  %v4301_v10 = vmul.f32 %v7565_v3, %v7565_v3 }
 0x84d   :  { %vm4281_vm3 = vcmp.gt.f32.partialorder %v4278_v4, 0.0  ;;  %v4284_v26 = vmul.f32 0.01, %v4278_v4  ;;  %v4290_v13 = vadd.f32 %v4289_v9, %v4288_v11  ;;  %v4524_v11 = vld [vmem:[%s7699_s20 + $0x8] sm:$0xff] }
 0x84e   :  { %v4304_v12 = vsel %vm145_vm1, %v4301_v10, 0.0 }
 0x84f   :  { %v7576_v15 = vsel %vm4281_vm3, %v4278_v4, %v4284_v26  ;;  %v4305_v19 = vadd.f32 %v4304_v12, %v4303_v16  ;;  %v4758_v12 = vld [vmem:[%s7700_s22] sm:$0xff] }
 0x850   :  { %v4292_v17 = vsel %vm4291_vm5, %v7576_v15, 0.0  ;;  %v4302_v18 = vmul.f32 %v7576_v15, %v7576_v15 }
 0x851   :  { %v4293_v21 = vadd.f32 %v4292_v17, %v4290_v13  ;;  %v4759_v13 = vld [vmem:[%s7700_s22 + $0x8] sm:$0x1] }
 0x852   :  { %v4306_v23 = vsel %vm4291_vm5, %v4302_v18, 0.0 }
 0x853   :  { %v4294_v24 = vrot.slane %v4293_v21, 4  ;;  %v4307_v33 = vadd.f32 %v4306_v23, %v4305_v19 }
 0x855   :  { %v4295_v35 = vadd.f32 %v4294_v24, %v4293_v21  ;;  %v4308_v37 = vrot.slane %v4307_v33, 4 }
 0x857   :  { %v4296_v38 = vrot.slane %v4295_v35, 2  ;;  %v4309_v40 = vadd.f32 %v4308_v37, %v4307_v33 }
 0x859   :  { %v4297_v41 = vadd.f32 %v4296_v38, %v4295_v35  ;;  %v4310_v43 = vrot.slane %v4309_v40, 2  ;;  %v4756_v35 = vld [vmem:[%s7702_s21] sm:$0xff] }
 0x85b   :  { %v4298_v49 = vrot.slane %v4297_v41, 1  ;;  %v4311_v44 = vadd.f32 %v4310_v43, %v4309_v40 }
 0x85d   :  { %v4312_v45 = vrot.slane %v4311_v44, 1  ;;  %v4299_v62 = vadd.f32 %v4298_v49, %v4297_v41 }
 0x85f   :  { %v4313_v8 = vadd.f32 %v4312_v45, %v4311_v44 }
 0x861   :  { %v4314_v20 = vsel %vm2417_vm9, %v4299_v62, %v4313_v8 }
 0x862   :  { %6028 = vmatmul.mubr.msk.f32.vlgmr.msra.gmra.mrb[114].mxu1 %vm145_vm1, %v4314_v20  ;;  %vm4431_vm1 = vcmask 15360  }
 0x863   :  { %6032 = vmatprep.mubr.msk.f32.mxu1 %vm6284_vm2, %v6285_v34  ;;  %6031 = vmatpush3.msk.msra.mxu1 %vm4435_vm6, %v4430_v22 }
 0x864   :  { %6105 = vmatprep.subr.bf16.mxu1 %v6283_v31 }
 0x935   :  { %v4388_v47 = vpop.f32.mrb[114].mxu1 }
 0x936   :  { %v4392_v6 = vmul.f32 0.027777778, %v4388_v47  ;;  %v6029_v46 = vpop.f32.mrb[115].mxu1 }
 0x938   :  { %v4393_v55 = vmul.f32 %v4392_v6, %v4392_v6 }
 0x93a   :  { %v4395_v14 = vrot.slane %v4393_v55, 7 }
 0x93c   :  { %v4397_v32 = vsub.f32 %v4392_v6, %v4395_v14 }
 0x93e   :  { %v4398_v48 = vmax.f32 %v4397_v32, 0.0 }
 0x940   :  { %v4400_v50 = vadd.f32 1e-05, %v4398_v48 }
 0x942   :  { %6277 = vrsqrt.f32 %v4400_v50  ;;  %v4757_v50 = vld [vmem:[%s7702_s21 + $0x8] sm:$0x1] }
 0x94c   :  { %v6278_v51 = vpop.eup %6277 }
 0x94d   :  { %v4409_v56 = vrot.slane %v6278_v51, %v7213_v60 }
 0x94f   :  { %v4410_v2 = vcombine.high %v4409_v56, %v4409_v56 }
 0x951   :  { %v4417_v53 = vrot.slane %v4410_v2, %v7213_v60  ;;  %v4526_v60 = vld [vmem:[%s7698_s19] sm:$0xff] }
 0x952   :  { %4640 = vrot.lane.b32.xlu1 %v4526_v60, %s6287_s3 }
 0x953   :  { %v4419_v61 = vmul.f32 %v4417_v53, %v4399_v52 }
 0x955   :  { %v4421_v54 = vmul.f32 %v4419_v61, %v4392_v6 }
 0x956   :  { %4642 = vrot.lane.b32.xlu1 %v4527_v39, %s6287_s3 }
 0x957   :  { %v4422_v57 = vsub.f32 %v4420_v29, %v4421_v54 }
 0x959   :  { %v4427_v59 = vrot.slane %v4422_v57, %v7223_v7 }
 0x95b   :  { %v4429_v30 = vsel %vm2417_vm9, %v4419_v61, %v4427_v59 }
 0x95c   :  { %6033 = vmatmul.mubr.msk.f32.vlgmr.msra.gmra.mrb[116].mxu1 %vm4431_vm1, %v4429_v30 }
 0x95d   :  { %6041 = vmatprep.mubr.msk.f32.mxu1 %vm6284_vm2, %v6285_v34 }
 0x9c4   :  { %v4641_v21 = vpop.permute.xlu1 %4640 }
 0x9c8   :  { %v4643_v24 = vpop.permute.xlu1 %4642 }
 0xa2f   :  { %v4505_v42 = vpop.f32.mrb[116].mxu1 }
 0xa30   :  { %v4512_v58 = vrot.slane %v4505_v42, %v7223_v7  ;;  %v6034_v28 = vpop.f32.mrb[117].mxu1  ;;  %v4519_v25 = vrot.slane %v4505_v42, %v7237_v27  ;;  %v4528_v7 = vld [vmem:[%s7698_s19 + $0x10] sm:$0x3]  ;;  %v4523_v27 = vld [vmem:[%s7699_s20] sm:$0xff] }
 0xa32   :  { %v4513_v36 = vmul.f32 %v4512_v58, %v7563_v63  ;;  %v4514_v0 = vmul.f32 %v4512_v58, %v7565_v3  ;;  %v4515_v10 = vmul.f32 %v4512_v58, %v7576_v15  ;;  %v6289_v63 = vmov 0   ;;  %v4525_v3 = vld [vmem:[%s7699_s20 + $0x10] sm:$0x3]  ;;  %v4861_v15 = vld [vmem:[%s7701_s24] sm:$0x3] }
 0xa33   :  { %6271 = vset.pattern.permute.xlu1 %v6289_v63  ;;  %6272 = vset.pattern.permute.xlu0 %v6289_v63 }
 0xa34   :  { %v4520_v1 = vadd.f32 %v4519_v25, %v4513_v36  ;;  %v4521_v4 = vadd.f32 %v4519_v25, %v4514_v0  ;;  %v4522_v26 = vadd.f32 %v4519_v25, %v4515_v10  ;;  %4624 = vperm.xlu1 %6271, %v4523_v27  }
 0xa36   :  { %v6266_v5 = vpack.i.bf16 %v4521_v4, %v4520_v1  ;;  %v6106_v9 = vpack.c.bf16 %v4521_v4, %v4520_v1 }
 0xa38   :  { %6267 = vrot.lane.b32.xlu0 %v6266_v5, %s6288_s9  ;;  %6107 = vmatpush3.bf16.msra.mxu1 %v6106_v9 }
 0xa39   :  { %6039 = vmatprep.subr.mxu1 %v6285_v34  ;;  %4634 = vperm.xlu1 %6271, %v4525_v3  }
 0xa3c   :  { %4652 = vrot.lane.b32.xlu0 %v4522_v26, %s6288_s9  ;;  %6040 = vmatpush3.msk.msra.mxu1 %vm4435_vm6, %v4522_v26 }
 0xa3d   :  { %6042 = vmatmul.mubr.msk.f32.vlgmr.msra.gmra.mrb[118].mxu1 %vm4529_vm7, %v4526_v60  ;;  %6108 = vmatprep.subr.bf16.mxu1 %v6283_v31 }
 0xa3e   :  { %6044 = vmatprep.mubr.msk.f32.mxu1 %vm6284_vm2, %v6285_v34  ;;  %4762 = vperm.xlu1 %6271, %v4758_v12  }
 0xa40   :  { %4644 = vrot.lane.b32.xlu0 %v4528_v7, %s6287_s3 }
 0xa41   :  { %6045 = vmatmul.mubr.msk.f32.gmra.mrb[120].mxu1 %vm4529_vm7, %v4527_v39 }
 0xa42   :  { %6047 = vmatprep.mubr.msk.f32.mxu1 %vm6284_vm2, %v6285_v34  ;;  %4864 = vperm.xlu1 %6271, %v4861_v15  }
 0xa44   :  { %4629 = vperm.xlu0 %6272, %v4524_v11  }
 0xa45   :  { %6048 = vmatmul.mubr.msk.f32.gmra.mrb[122].mxu1 %vm4529_vm7, %v4528_v7 }
 0xa46   :  { %6056 = vmatprep.mubr.msk.f32.mxu1 %vm6284_vm2, %v6285_v34 }
 0xa48   :  { %4767 = vperm.xlu0 %6272, %v4759_v13  }
 0xaaa   :  { %v6268_v16 = vpop.permute.xlu0 %6267 }
 0xaab   :  { %v6270_v17 = vunpack.i.h.bf16 %v6268_v16  ;;  %v6269_v18 = vunpack.i.l.bf16 %v6268_v16 }
 0xaad   :  { %v6109_v19 = vpack.c.bf16 %v6270_v17, %v6269_v18 }
 0xaae   :  { %v4653_v23 = vpop.permute.xlu0 %4652 }
 0xaaf   :  { %6110 = vmatpush3.bf16.msra.mxu1 %v6109_v19 }
 0xab0   :  { %6054 = vmatprep.subr.mxu1 %v6285_v34 }
 0xab2   :  { %v4645_v33 = vpop.permute.xlu0 %4644 }
 0xab3   :  { %6055 = vmatpush3.msk.msra.mxu1 %vm4435_vm6, %v4653_v23  ;;  %v4625_v37 = vpop.permute.xlu1 %4624 }
 0xab4   :  { %6057 = vmatmul.mubr.msk.f32.vlgmr.msra.gmra.mrb[118].mxu1 %vm4529_vm7, %v4641_v21 }
 0xab5   :  { %6059 = vmatprep.mubr.msk.f32.mxu1 %vm6284_vm2, %v6285_v34 }
 0xab8   :  { %6060 = vmatmul.mubr.msk.f32.gmra.mrb[120].mxu1 %vm4529_vm7, %v4643_v24  ;;  %v4635_v20 = vpop.permute.xlu1 %4634 }
 0xab9   :  { %6062 = vmatprep.mubr.msk.f32.mxu1 %vm6284_vm2, %v6285_v34 }
 0xabc   :  { %6063 = vmatmul.mubr.msk.f32.gmra.mrb[122].mxu1 %vm4529_vm7, %v4645_v33 }
 0xabd   :  { %6071 = vmatprep.mubr.msk.f32.mxu1 %vm4529_vm7, %v4756_v35  ;;  %v4763_v2 = vpop.permute.xlu1 %4762 }
 0xac3   :  { %v4630_v43 = vpop.permute.xlu0 %4629 }
 0xac7   :  { %v4768_v51 = vpop.permute.xlu0 %4767 }
 0xb87   :  { %v4730_v38 = vpop.f32.mrb[118].mxu1 }
 0xb88   :  { %v6127_v40 = vadd.f32 %v4730_v38, %v4625_v37  ;;  %v6058_v41 = vpop.f32.mrb[119].mxu1 }
 0xb8a   :  { %v4750_v44 = vmul.f32 0.01, %v6127_v40  ;;  %vm4747_vm8 = vcmp.gt.f32.partialorder %v6127_v40, 0.0 }
 0xb8b   :  { %v4735_v49 = vpop.f32.mrb[120].mxu1 }
 0xb8c   :  { %v6128_v45 = vadd.f32 %v4735_v49, %v4630_v43  ;;  %v6061_v62 = vpop.f32.mrb[121].mxu1  ;;  %v4753_v46 = vsel %vm4747_vm8, %v6127_v40, %v4750_v44 }
 0xb8e   :  { %vm4748_vm10 = vcmp.gt.f32.partialorder %v6128_v45, 0.0  ;;  %v4751_v8 = vmul.f32 0.01, %v6128_v45 }
 0xb8f   :  { %v4740_v22 = vpop.f32.mrb[122].mxu1 }
 0xb90   :  { %v6129_v47 = vadd.f32 %v4740_v22, %v4635_v20  ;;  %v6064_v6 = vpop.f32.mrb[123].mxu1  ;;  %v4754_v55 = vsel %vm4748_vm10, %v6128_v45, %v4751_v8 }
 0xb91   :  { %v6111_v14 = vpack.c.bf16 %v4754_v55, %v4753_v46 }
 0xb92   :  { %vm4749_vm4 = vcmp.gt.f32.partialorder %v6129_v47, 0.0  ;;  %v4752_v32 = vmul.f32 0.01, %v6129_v47 }
 0xb93   :  { %6112 = vmatprep.subr.bf16.mxu1 %v6111_v14 }
 0xb94   :  { %6114 = vmatpush3.bf16.msra.mxu1 %v6111_v14  ;;  %v4755_v48 = vsel %vm4749_vm4, %v6129_v47, %v4752_v32 }
 0xb95   :  { %6069 = vmatprep.subr.msk.mxu1 %vm4435_vm6, %v4755_v48 }
 0xb98   :  { %6070 = vmatpush3.msk.msra.mxu1 %vm4435_vm6, %v4755_v48 }
 0xb99   :  { %6072 = vmatmul.mubr.msk.f32.vlgmr.msra.gmra.mrb[124].mxu1 %vm4529_vm7, %v4757_v50  ;;  %6115 = vmatprep.subr.bf16.mxu1 %v6283_v31  ;;  %v4860_v31 = vld [vmem:[%s7703_s23] sm:$0x3] }
 0xb9a   :  { %6078 = vmatprep.mubr.msk.f32.mxu1 %vm6284_vm2, %v6285_v34  ;;  %vm4867_vm2 = vcmask 72704   ;;  %v4865_v34 = vpop.permute.xlu1 %4864 }
 0xc6c   :  { %v6073_v56 = vpop.f32.mrb[124].mxu1 }
 0xc6d   :  { %v4851_v52 = vadd.f32 %v6073_v56, %v4768_v51  ;;  %v4845_v53 = vpop.f32.mrb[125].mxu1 }
 0xc6e   :  { %v4846_v61 = vadd.f32 %v4845_v53, %v4763_v2 }
 0xc6f   :  { %vm4855_vm11 = vcmp.gt.f32.partialorder %v4851_v52, 0.0  ;;  %v4857_v29 = vmul.f32 0.01, %v4851_v52 }
 0xc70   :  { %vm4854_vm12 = vcmp.gt.f32.partialorder %v4846_v61, 0.0  ;;  %v4856_v54 = vmul.f32 0.01, %v4846_v61 }
 0xc71   :  { %v4859_v57 = vsel %vm4855_vm11, %v4851_v52, %v4857_v29 }
 0xc72   :  { %v4858_v59 = vsel %vm4854_vm12, %v4846_v61, %v4856_v54 }
 0xc73   :  { %v6116_v30 = vpack.c.bf16 %v4859_v57, %v4858_v59 }
 0xc75   :  { %6118 = vmatpush3.bf16.msk.msra.mxu1 %vm6117_vm14, %v6116_v30 }
 0xc78   :  { %6079 = vmatmul.mubr.msk.f32.vlgmr.msra.gmra.mrb[126].mxu1 %vm4867_vm2, %v4860_v31 }
 0xd4b   :  { %v4940_v60 = vpop.f32.mrb[126].mxu1 }
 0xd4c   :  { %v4941_v39 = vadd.f32 %v4940_v60, %v4865_v34  ;;  %v6080_v42 = vpop.f32.mrb[127].mxu1 }
 0xd4e   :  { %v4944_v58 = vsub.f32 0.0, %v4941_v39 }
 0xd50   :  { %v4945_v28 = vmul.f32 1.442695, %v4944_v58 }
 0xd52   :  { %6279 = vpow2.f32 %v4945_v28 }
 0xd5c   :  { %v6280_v25 = vpop.eup %6279 }
 0xd5d   :  { %v4947_v36 = vadd.f32 1.0, %v6280_v25 }
 0xd5f   :  { %6281 = vrcp.f32 %v4947_v36 }
 0xd69   :  { %v6282_v0 = vpop.eup %6281 }
 0xd6a   :  { %4950 = vst.msk [vmem:[%s7704_s25] sm:$0x3] %vm4949_vm0, %v6282_v0 }

</bundles_post_ra>
